<compile_context>
chip_gen: v7x
topology: tpu7x:2x2x1
jax: 0.10.0
libtpu: 0.0.40
codegen_flags: <defaults>
</compile_context>

<pallas_src>
import math
import jax
import jax.numpy as jnp
from jax.experimental import pallas as pl
from jax.experimental.pallas import tpu as pltpu

B = 2            # batch
S = 8            # sequence length (= sublane tile)
D_MODEL = 128    # lane-dense model dim
N_HEADS = 4
D_K = D_V = 32   # d_model / n_heads, like 768/12 in the original
D_FF = 4 * D_MODEL
LN_EPS = 1e-5    # PyTorch nn.LayerNorm default eps
SCALE = 1.0 / math.sqrt(D_K)


# ----------------------------- in-kernel helpers -----------------------------

def _erf(x):
    # Abramowitz & Stegun 7.1.26 polynomial, |err| < 1.5e-7 (fp32-level accuracy).
    # Kept (instead of a tanh approximation) to match torch.erf-based gelu closely.
    p = 0.3275911
    a1, a2, a3, a4, a5 = 0.254829592, -0.284496736, 1.421413741, -1.453152027, 1.061405429
    s = jnp.where(x >= 0.0, 1.0, -1.0)
    ax = jnp.abs(x)
    t = 1.0 / (1.0 + p * ax)          # exact divide kept: approx rcp would cost ~1e-2 erf error
    poly = ((((a5 * t + a4) * t + a3) * t + a2) * t + a1) * t
    return s * (1.0 - poly * jnp.exp(-ax * ax))


def _gelu(x):
    # matches: x * 0.5 * (1 + erf(x / sqrt(2)))
    return x * 0.5 * (1.0 + _erf(x / math.sqrt(2.0)))


# --------------------------------- fused kernel -------------------------------

def encoder_layer_kernel(x_ref, mask_ref,
                         wqkv_ref, bqkv_ref, wo_ref, bo_ref,
                         gamma_ref, beta_ref,
                         w1_ref, b1_ref, w2_ref, b2_ref, out_ref):
    """One batch element per grid step.

    x_ref    : (S, D_MODEL) f32      lane-dense activations for this batch element
    mask_ref : (1, S, S) int32       self-attention mask (non-zero = masked)
    wqkv     : (D_MODEL, 3*H*D_K) bf16  fused [Wq | Wk | Wv] slab; bqkv (1, 3*H*D_K) f32
    wo       : (H*D_V, D_MODEL) bf16, bo (1, D_MODEL) f32
    gamma/beta: (1, D_MODEL) f32     LayerNorm affine
    w1/b1, w2/b2: FFN weights (bf16 / f32 bias)
    """
    x = x_ref[...]                                    # (S, D_MODEL) f32
    x_b = x.astype(jnp.bfloat16)

    # ---- fused QKV projection: one lane-dense (S,128)x(128,384) MXU op ----
    qkv = jnp.dot(x_b, wqkv_ref[...],
                  preferred_element_type=jnp.float32) + bqkv_ref[...]   # (S, 384) f32

    mask_bool = mask_ref[0] != 0                      # (S, S), hoisted out of head loop
    q_off, k_off, v_off = 0, N_HEADS * D_K, 2 * N_HEADS * D_K

    # ---- per-head scaled-dot-product attention (d_k=32 contraction is inherently
    #      per-head; lane-aligned 32-wide slices, 2-D MXU dots only) ----
    ctx_parts = []
    for h in range(N_HEADS):                          # static unroll, H=4
        qh = qkv[:, q_off + h * D_K: q_off + (h + 1) * D_K].astype(jnp.bfloat16)
        kh = qkv[:, k_off + h * D_K: k_off + (h + 1) * D_K].astype(jnp.bfloat16)
        vh = qkv[:, v_off + h * D_V: v_off + (h + 1) * D_V].astype(jnp.bfloat16)

        s = jnp.einsum('qd,kd->qk', qh, kh,
                       preferred_element_type=jnp.float32) * SCALE      # (S, S) f32
        s = jnp.where(mask_bool, -1e9, s)             # masked_fill_(attn_mask, -1e9)

        m = jnp.max(s, axis=-1, keepdims=True)
        e = jnp.exp(s - m)
        denom = jnp.sum(e, axis=-1, keepdims=True)
        attn = e * pl.reciprocal(denom, approx=True)  # EUP slot instead of VALU divide

        ctx_parts.append(jnp.dot(attn.astype(jnp.bfloat16), vh,
                                 preferred_element_type=jnp.float32))   # (S, D_V)

    ctx2d = jnp.concatenate(ctx_parts, axis=1)        # (S, H*D_V) = (S, 128)

    # ---- folded output projection (single K=128 matmul) + residual ----
    attn_out = (jnp.dot(ctx2d.astype(jnp.bfloat16), wo_ref[...],
                        preferred_element_type=jnp.float32)
                + bo_ref[...] + x)                    # (S, D_MODEL) f32

    # ---- LayerNorm(d_model), f32 ----
    mean = jnp.mean(attn_out, axis=-1, keepdims=True)
    cen = attn_out - mean
    var = jnp.mean(cen * cen, axis=-1, keepdims=True)
    normed = cen * jax.lax.rsqrt(var + LN_EPS) * gamma_ref[...] + beta_ref[...]

    # ---- Position-wise FFN: fc1 -> erf-gelu -> fc2 (no residual/LN, as in reference) ----
    h1 = jnp.dot(normed.astype(jnp.bfloat16), w1_ref[...],
                 preferred_element_type=jnp.float32) + b1_ref[...]      # (S, D_FF)
    h1 = _gelu(h1)                                    # f32 elementwise
    out_ref[...] = jnp.dot(h1.astype(jnp.bfloat16), w2_ref[...],
                           preferred_element_type=jnp.float32) + b2_ref[...]


# --------------------------------- wrapper ------------------------------------

def _const_spec(shape):
    n = len(shape)
    return pl.BlockSpec(shape, lambda b: (0,) * n)


def _cost_estimate():
    mm_flops = 2 * B * S * (
        D_MODEL * 3 * N_HEADS * D_K          # fused QKV
        + N_HEADS * S * D_K                  # scores
        + N_HEADS * S * D_V                  # attn @ V
        + N_HEADS * D_V * D_MODEL            # out-proj
        + D_MODEL * D_FF                     # fc1
        + D_FF * D_MODEL)                    # fc2
    trans = B * S * (N_HEADS * S + D_FF)     # softmax exp + gelu exp
    bytes_acc = (4 * (2 * B * S * D_MODEL + B * S * S)
                 + 2 * (D_MODEL * 3 * N_HEADS * D_K + N_HEADS * D_V * D_MODEL
                        + D_MODEL * D_FF + D_FF * D_MODEL)
                 + 4 * (3 * N_HEADS * D_K + 3 * D_MODEL + D_FF))
    return pl.CostEstimate(flops=mm_flops, transcendentals=trans,
                           bytes_accessed=bytes_acc)


def encoder_layer(enc_inputs, enc_self_attn_mask, p):
    # Wrapper-side layout plumbing: lane-dense activations, fused bf16 QKV weight slab.
    x2d = enc_inputs.reshape(B * S, D_MODEL)
    mask_i32 = enc_self_attn_mask.astype(jnp.int32)

    wqkv = jnp.concatenate([p["wq"], p["wk"], p["wv"]], axis=1).astype(jnp.bfloat16)
    bqkv = jnp.concatenate([p["bq"], p["bk"], p["bv"]], axis=1)          # f32
    wo = p["wo"].astype(jnp.bfloat16)
    w1 = p["w1"].astype(jnp.bfloat16)
    w2 = p["w2"].astype(jnp.bfloat16)

    grid_spec = pl.GridSpec(
        grid=(B,),                                    # one batch element per step
        in_specs=[
            pl.BlockSpec((S, D_MODEL), lambda b: (b, 0)),        # x rows for this batch
            pl.BlockSpec((1, S, S), lambda b: (b, 0, 0)),        # int mask for this batch
            _const_spec((D_MODEL, 3 * N_HEADS * D_K)),           # wqkv (VMEM-resident)
            _const_spec((1, 3 * N_HEADS * D_K)),                 # bqkv
            _const_spec((N_HEADS * D_V, D_MODEL)),               # wo
            _const_spec((1, D_MODEL)),                           # bo
            _const_spec((1, D_MODEL)),                           # gamma
            _const_spec((1, D_MODEL)),                           # beta
            _const_spec((D_MODEL, D_FF)),                        # w1
            _const_spec((1, D_FF)),                              # b1
            _const_spec((D_FF, D_MODEL)),                        # w2
            _const_spec((1, D_MODEL)),                           # b2
        ],
        out_specs=pl.BlockSpec((S, D_MODEL), lambda b: (b, 0)),  # lane-dense (last dim 128)
    )
    out2d = pl.pallas_call(
        encoder_layer_kernel,
        out_shape=jax.ShapeDtypeStruct((B * S, D_MODEL), jnp.float32),
        grid_spec=grid_spec,
        cost_estimate=_cost_estimate(),
        compiler_params=pltpu.CompilerParams(
            dimension_semantics=("parallel",)),       # shards over v7x's 2 TCs when scaled
    )(x2d, mask_i32, wqkv, bqkv, wo, p["bo"],
      p["ln_gamma"], p["ln_beta"], w1, p["b1"], w2, p["b2"])
    return out2d.reshape(B, S, D_MODEL)


encoder_layer_jit = jax.jit(encoder_layer)


# ------------------------------ params & reference ---------------------------

def init_params(key):
    def linear(k, fan_in, fan_out):
        bound = 1.0 / math.sqrt(fan_in)
        kw, kb = jax.random.split(k)
        w = jax.random.uniform(kw, (fan_in, fan_out), jnp.float32, -bound, bound)
        b = jax.random.uniform(kb, (1, fan_out), jnp.float32, -bound, bound)
        return w, b

    keys = jax.random.split(key, 6)
    wq, bq = linear(keys[0], D_MODEL, N_HEADS * D_K)
    wk, bk = linear(keys[1], D_MODEL, N_HEADS * D_K)
    wv, bv = linear(keys[2], D_MODEL, N_HEADS * D_V)
    wo, bo = linear(keys[3], N_HEADS * D_V, D_MODEL)
    w1, b1 = linear(keys[4], D_MODEL, D_FF)
    w2, b2 = linear(keys[5], D_FF, D_MODEL)
    return dict(
        wq=wq, bq=bq, wk=wk, bk=bk, wv=wv, bv=bv, wo=wo, bo=bo,
        ln_gamma=jnp.ones((1, D_MODEL), jnp.float32),
        ln_beta=jnp.zeros((1, D_MODEL), jnp.float32),
        w1=w1, b1=b1, w2=w2, b2=b2,
    )


def reference(x, mask, p):
    # Pure-JAX f32 mirror of the PyTorch module (erf-gelu, -1e9 masked_fill, LN eps,
    # no FFN residual).
    q = (x @ p["wq"] + p["bq"][0]).reshape(B, S, N_HEADS, D_K).transpose(0, 2, 1, 3)
    k = (x @ p["wk"] + p["bk"][0]).reshape(B, S, N_HEADS, D_K).transpose(0, 2, 1, 3)
    v = (x @ p["wv"] + p["bv"][0]).reshape(B, S, N_HEADS, D_V).transpose(0, 2, 1, 3)
    scores = jnp.einsum("bhqd,bhkd->bhqk", q, k) * SCALE
    scores = jnp.where(mask[:, None, :, :] != 0, -1e9, scores)
    attn = jax.nn.softmax(scores, axis=-1)
    ctx = jnp.einsum("bhqk,bhkd->bhqd", attn, v).transpose(0, 2, 1, 3).reshape(B, S, N_HEADS * D_V)
    out = ctx @ p["wo"] + p["bo"][0] + x
    mean = out.mean(-1, keepdims=True)
    var = ((out - mean) ** 2).mean(-1, keepdims=True)
    out = (out - mean) / jnp.sqrt(var + LN_EPS) * p["ln_gamma"][0] + p["ln_beta"][0]
    h = out @ p["w1"] + p["b1"][0]
    h = h * 0.5 * (1.0 + jax.scipy.special.erf(h / math.sqrt(2.0)))
    return h @ p["w2"] + p["b2"][0]


# ----------------------------------- main -------------------------------------

if __name__ == "__main__":
    key = jax.random.PRNGKey(0)
    k_x, k_p = jax.random.split(key)
    enc_inputs = jax.random.normal(k_x, (B, S, D_MODEL), jnp.float32)
    # padding-style self-attention mask: last 2 key positions masked for batch 1
    attn_mask = jnp.zeros((B, S, S), jnp.int32).at[1, :, S - 2:].set(1)
    params = init_params(k_p)

    out = jax.block_until_ready(encoder_layer_jit(enc_inputs, attn_mask, params))

    ref = reference(enc_inputs, attn_mask, params)
    assert out.shape == (B, S, D_MODEL)
    # Tolerance absorbs bf16-operand MXU matmuls (f32 accumulation) + approx softmax rcp;
    # structural bugs would be O(1) off, so this still verifies correctness.
    assert jnp.allclose(out, ref, rtol=3e-2, atol=3e-2), "mismatch vs pure-JAX reference"
    print("KERNEL_OK")
</pallas_src>

<mosaic_0001>
module attributes {stable_mosaic.version = 11 : i64} {
  func.func @encoder_layer_kernel(%arg0: i32, %arg1: memref<8x128xf32, #tpu.memory_space<vmem>>, %arg2: memref<1x8x8xi32, #tpu.memory_space<vmem>>, %arg3: memref<128x384xbf16, #tpu.memory_space<vmem>>, %arg4: memref<1x384xf32, #tpu.memory_space<vmem>>, %arg5: memref<128x128xbf16, #tpu.memory_space<vmem>>, %arg6: memref<1x128xf32, #tpu.memory_space<vmem>>, %arg7: memref<1x128xf32, #tpu.memory_space<vmem>>, %arg8: memref<1x128xf32, #tpu.memory_space<vmem>>, %arg9: memref<128x512xbf16, #tpu.memory_space<vmem>>, %arg10: memref<1x512xf32, #tpu.memory_space<vmem>>, %arg11: memref<512x128xbf16, #tpu.memory_space<vmem>>, %arg12: memref<1x128xf32, #tpu.memory_space<vmem>>, %arg13: memref<8x128xf32, #tpu.memory_space<vmem>>) attributes {dimension_semantics = [#tpu.dimension_semantics<parallel>], iteration_bounds = array<i64: 2>, scalar_prefetch = 0 : i64, scratch_operands = 0 : i64, tpu.core_type = #tpu.core_type<tc>, window_params = [{transform_indices = @transform_0, window_bounds = array<i64: 8, 128>}, {transform_indices = @transform_1, window_bounds = array<i64: 1, 8, 8>}, {pipeline_mode = #tpu.pipeline_mode<synchronous>, transform_indices = @transform_2, window_bounds = array<i64: 128, 384>}, {pipeline_mode = #tpu.pipeline_mode<synchronous>, transform_indices = @transform_3, window_bounds = array<i64: 1, 384>}, {pipeline_mode = #tpu.pipeline_mode<synchronous>, transform_indices = @transform_4, window_bounds = array<i64: 128, 128>}, {pipeline_mode = #tpu.pipeline_mode<synchronous>, transform_indices = @transform_5, window_bounds = array<i64: 1, 128>}, {pipeline_mode = #tpu.pipeline_mode<synchronous>, transform_indices = @transform_6, window_bounds = array<i64: 1, 128>}, {pipeline_mode = #tpu.pipeline_mode<synchronous>, transform_indices = @transform_7, window_bounds = array<i64: 1, 128>}, {pipeline_mode = #tpu.pipeline_mode<synchronous>, transform_indices = @transform_8, window_bounds = array<i64: 128, 512>}, {pipeline_mode = #tpu.pipeline_mode<synchronous>, transform_indices = @transform_9, window_bounds = array<i64: 1, 512>}, {pipeline_mode = #tpu.pipeline_mode<synchronous>, transform_indices = @transform_10, window_bounds = array<i64: 512, 128>}, {pipeline_mode = #tpu.pipeline_mode<synchronous>, transform_indices = @transform_11, window_bounds = array<i64: 1, 128>}, {transform_indices = @transform_12, window_bounds = array<i64: 8, 128>}]} {
    %c0 = arith.constant 0 : index
    %c0_0 = arith.constant 0 : index
    %0 = vector.load %arg1[%c0, %c0_0] : memref<8x128xf32, #tpu.memory_space<vmem>>, vector<8x128xf32>
    %1 = arith.truncf %0 : vector<8x128xf32> to vector<8x128xbf16>
    %c0_1 = arith.constant 0 : index
    %c0_2 = arith.constant 0 : index
    %2 = vector.load %arg3[%c0_1, %c0_2] : memref<128x384xbf16, #tpu.memory_space<vmem>>, vector<128x384xbf16>
    %cst = arith.constant dense<0.000000e+00> : vector<8x384xf32>
    %3 = tpu.matmul %1, %2, %cst {dimension_numbers = #tpu.dot_dimension_numbers<[1], [0], [0], [1], [0, 0, 1, 1], [], []>} : vector<8x128xbf16>, vector<128x384xbf16>, vector<8x384xf32> -> vector<8x384xf32>
    %c0_3 = arith.constant 0 : index
    %c0_4 = arith.constant 0 : index
    %4 = vector.load %arg4[%c0_3, %c0_4] : memref<1x384xf32, #tpu.memory_space<vmem>>, vector<1x384xf32>
    %5 = vector.broadcast %4 : vector<1x384xf32> to vector<8x384xf32>
    %6 = arith.addf %3, %5 : vector<8x384xf32>
    %c0_5 = arith.constant 0 : index
    %c0_6 = arith.constant 0 : index
    %c0_7 = arith.constant 0 : index
    %7 = vector.load %arg2[%c0_5, %c0_6, %c0_7] : memref<1x8x8xi32, #tpu.memory_space<vmem>>, vector<1x8x8xi32>
    %8 = vector.shape_cast %7 : vector<1x8x8xi32> to vector<8x8xi32>
    %c0_i32 = arith.constant 0 : i32
    %9 = vector.broadcast %c0_i32 : i32 to vector<8x8xi32>
    %10 = arith.cmpi ne, %8, %9 : vector<8x8xi32>
    %11 = vector.extract_strided_slice %6 {offsets = [0, 0], sizes = [8, 32], strides = [1, 1]} : vector<8x384xf32> to vector<8x32xf32>
    %12 = arith.truncf %11 : vector<8x32xf32> to vector<8x32xbf16>
    %13 = vector.extract_strided_slice %6 {offsets = [0, 128], sizes = [8, 32], strides = [1, 1]} : vector<8x384xf32> to vector<8x32xf32>
    %14 = arith.truncf %13 : vector<8x32xf32> to vector<8x32xbf16>
    %15 = vector.extract_strided_slice %6 {offsets = [0, 256], sizes = [8, 32], strides = [1, 1]} : vector<8x384xf32> to vector<8x32xf32>
    %16 = arith.truncf %15 : vector<8x32xf32> to vector<8x32xbf16>
    "tpu.trace_start"() <{level = 10 : i32, message = "qd,kd->qk"}> : () -> ()
    %cst_8 = arith.constant dense<0.000000e+00> : vector<8x8xf32>
    %17 = tpu.matmul %12, %14, %cst_8 {dimension_numbers = #tpu.dot_dimension_numbers<[1], [1], [0], [0], [0, 0, 1, 0], [], []>} : vector<8x32xbf16>, vector<8x32xbf16>, vector<8x8xf32> -> vector<8x8xf32>
    "tpu.trace_stop"() : () -> ()
    %cst_9 = arith.constant 0.176776692 : f32
    %18 = vector.broadcast %cst_9 : f32 to vector<8x8xf32>
    %19 = arith.mulf %17, %18 : vector<8x8xf32>
    %cst_10 = arith.constant -1.000000e+09 : f32
    %20 = vector.broadcast %cst_10 : f32 to vector<8x8xf32>
    %21 = arith.select %10, %20, %19 : vector<8x8xi1>, vector<8x8xf32>
    %cst_11 = arith.constant dense<0xFF800000> : vector<8xf32>
    %22 = vector.multi_reduction <maximumf>, %21, %cst_11 [1] : vector<8x8xf32> to vector<8xf32>
    %23 = vector.shape_cast %22 : vector<8xf32> to vector<8x1xf32>
    %24 = vector.broadcast %23 : vector<8x1xf32> to vector<8x8xf32>
    %25 = arith.subf %21, %24 : vector<8x8xf32>
    %26 = math.exp %25 : vector<8x8xf32>
    %cst_12 = arith.constant dense<0.000000e+00> : vector<8xf32>
    %27 = vector.multi_reduction <add>, %26, %cst_12 [1] : vector<8x8xf32> to vector<8xf32>
    %28 = vector.shape_cast %27 : vector<8xf32> to vector<8x1xf32>
    %29 = tpu.reciprocal %28 {approx = true} : vector<8x1xf32> -> vector<8x1xf32>
    %30 = vector.broadcast %29 : vector<8x1xf32> to vector<8x8xf32>
    %31 = arith.mulf %26, %30 : vector<8x8xf32>
    %32 = arith.truncf %31 : vector<8x8xf32> to vector<8x8xbf16>
    %cst_13 = arith.constant dense<0.000000e+00> : vector<8x32xf32>
    %33 = tpu.matmul %32, %16, %cst_13 {dimension_numbers = #tpu.dot_dimension_numbers<[1], [0], [0], [1], [0, 0, 1, 1], [], []>} : vector<8x8xbf16>, vector<8x32xbf16>, vector<8x32xf32> -> vector<8x32xf32>
    %34 = vector.extract_strided_slice %6 {offsets = [0, 32], sizes = [8, 32], strides = [1, 1]} : vector<8x384xf32> to vector<8x32xf32>
    %35 = arith.truncf %34 : vector<8x32xf32> to vector<8x32xbf16>
    %36 = vector.extract_strided_slice %6 {offsets = [0, 160], sizes = [8, 32], strides = [1, 1]} : vector<8x384xf32> to vector<8x32xf32>
    %37 = arith.truncf %36 : vector<8x32xf32> to vector<8x32xbf16>
    %38 = vector.extract_strided_slice %6 {offsets = [0, 288], sizes = [8, 32], strides = [1, 1]} : vector<8x384xf32> to vector<8x32xf32>
    %39 = arith.truncf %38 : vector<8x32xf32> to vector<8x32xbf16>
    "tpu.trace_start"() <{level = 10 : i32, message = "qd,kd->qk"}> : () -> ()
    %cst_14 = arith.constant dense<0.000000e+00> : vector<8x8xf32>
    %40 = tpu.matmul %35, %37, %cst_14 {dimension_numbers = #tpu.dot_dimension_numbers<[1], [1], [0], [0], [0, 0, 1, 0], [], []>} : vector<8x32xbf16>, vector<8x32xbf16>, vector<8x8xf32> -> vector<8x8xf32>
    "tpu.trace_stop"() : () -> ()
    %cst_15 = arith.constant 0.176776692 : f32
    %41 = vector.broadcast %cst_15 : f32 to vector<8x8xf32>
    %42 = arith.mulf %40, %41 : vector<8x8xf32>
    %cst_16 = arith.constant -1.000000e+09 : f32
    %43 = vector.broadcast %cst_16 : f32 to vector<8x8xf32>
    %44 = arith.select %10, %43, %42 : vector<8x8xi1>, vector<8x8xf32>
    %cst_17 = arith.constant dense<0xFF800000> : vector<8xf32>
    %45 = vector.multi_reduction <maximumf>, %44, %cst_17 [1] : vector<8x8xf32> to vector<8xf32>
    %46 = vector.shape_cast %45 : vector<8xf32> to vector<8x1xf32>
    %47 = vector.broadcast %46 : vector<8x1xf32> to vector<8x8xf32>
    %48 = arith.subf %44, %47 : vector<8x8xf32>
    %49 = math.exp %48 : vector<8x8xf32>
    %cst_18 = arith.constant dense<0.000000e+00> : vector<8xf32>
    %50 = vector.multi_reduction <add>, %49, %cst_18 [1] : vector<8x8xf32> to vector<8xf32>
    %51 = vector.shape_cast %50 : vector<8xf32> to vector<8x1xf32>
    %52 = tpu.reciprocal %51 {approx = true} : vector<8x1xf32> -> vector<8x1xf32>
    %53 = vector.broadcast %52 : vector<8x1xf32> to vector<8x8xf32>
    %54 = arith.mulf %49, %53 : vector<8x8xf32>
    %55 = arith.truncf %54 : vector<8x8xf32> to vector<8x8xbf16>
    %cst_19 = arith.constant dense<0.000000e+00> : vector<8x32xf32>
    %56 = tpu.matmul %55, %39, %cst_19 {dimension_numbers = #tpu.dot_dimension_numbers<[1], [0], [0], [1], [0, 0, 1, 1], [], []>} : vector<8x8xbf16>, vector<8x32xbf16>, vector<8x32xf32> -> vector<8x32xf32>
    %57 = vector.extract_strided_slice %6 {offsets = [0, 64], sizes = [8, 32], strides = [1, 1]} : vector<8x384xf32> to vector<8x32xf32>
    %58 = arith.truncf %57 : vector<8x32xf32> to vector<8x32xbf16>
    %59 = vector.extract_strided_slice %6 {offsets = [0, 192], sizes = [8, 32], strides = [1, 1]} : vector<8x384xf32> to vector<8x32xf32>
    %60 = arith.truncf %59 : vector<8x32xf32> to vector<8x32xbf16>
    %61 = vector.extract_strided_slice %6 {offsets = [0, 320], sizes = [8, 32], strides = [1, 1]} : vector<8x384xf32> to vector<8x32xf32>
    %62 = arith.truncf %61 : vector<8x32xf32> to vector<8x32xbf16>
    "tpu.trace_start"() <{level = 10 : i32, message = "qd,kd->qk"}> : () -> ()
    %cst_20 = arith.constant dense<0.000000e+00> : vector<8x8xf32>
    %63 = tpu.matmul %58, %60, %cst_20 {dimension_numbers = #tpu.dot_dimension_numbers<[1], [1], [0], [0], [0, 0, 1, 0], [], []>} : vector<8x32xbf16>, vector<8x32xbf16>, vector<8x8xf32> -> vector<8x8xf32>
    "tpu.trace_stop"() : () -> ()
    %cst_21 = arith.constant 0.176776692 : f32
    %64 = vector.broadcast %cst_21 : f32 to vector<8x8xf32>
    %65 = arith.mulf %63, %64 : vector<8x8xf32>
    %cst_22 = arith.constant -1.000000e+09 : f32
    %66 = vector.broadcast %cst_22 : f32 to vector<8x8xf32>
    %67 = arith.select %10, %66, %65 : vector<8x8xi1>, vector<8x8xf32>
    %cst_23 = arith.constant dense<0xFF800000> : vector<8xf32>
    %68 = vector.multi_reduction <maximumf>, %67, %cst_23 [1] : vector<8x8xf32> to vector<8xf32>
    %69 = vector.shape_cast %68 : vector<8xf32> to vector<8x1xf32>
    %70 = vector.broadcast %69 : vector<8x1xf32> to vector<8x8xf32>
    %71 = arith.subf %67, %70 : vector<8x8xf32>
    %72 = math.exp %71 : vector<8x8xf32>
    %cst_24 = arith.constant dense<0.000000e+00> : vector<8xf32>
    %73 = vector.multi_reduction <add>, %72, %cst_24 [1] : vector<8x8xf32> to vector<8xf32>
    %74 = vector.shape_cast %73 : vector<8xf32> to vector<8x1xf32>
    %75 = tpu.reciprocal %74 {approx = true} : vector<8x1xf32> -> vector<8x1xf32>
    %76 = vector.broadcast %75 : vector<8x1xf32> to vector<8x8xf32>
    %77 = arith.mulf %72, %76 : vector<8x8xf32>
    %78 = arith.truncf %77 : vector<8x8xf32> to vector<8x8xbf16>
    %cst_25 = arith.constant dense<0.000000e+00> : vector<8x32xf32>
    %79 = tpu.matmul %78, %62, %cst_25 {dimension_numbers = #tpu.dot_dimension_numbers<[1], [0], [0], [1], [0, 0, 1, 1], [], []>} : vector<8x8xbf16>, vector<8x32xbf16>, vector<8x32xf32> -> vector<8x32xf32>
    %80 = vector.extract_strided_slice %6 {offsets = [0, 96], sizes = [8, 32], strides = [1, 1]} : vector<8x384xf32> to vector<8x32xf32>
    %81 = arith.truncf %80 : vector<8x32xf32> to vector<8x32xbf16>
    %82 = vector.extract_strided_slice %6 {offsets = [0, 224], sizes = [8, 32], strides = [1, 1]} : vector<8x384xf32> to vector<8x32xf32>
    %83 = arith.truncf %82 : vector<8x32xf32> to vector<8x32xbf16>
    %84 = vector.extract_strided_slice %6 {offsets = [0, 352], sizes = [8, 32], strides = [1, 1]} : vector<8x384xf32> to vector<8x32xf32>
    %85 = arith.truncf %84 : vector<8x32xf32> to vector<8x32xbf16>
    "tpu.trace_start"() <{level = 10 : i32, message = "qd,kd->qk"}> : () -> ()
    %cst_26 = arith.constant dense<0.000000e+00> : vector<8x8xf32>
    %86 = tpu.matmul %81, %83, %cst_26 {dimension_numbers = #tpu.dot_dimension_numbers<[1], [1], [0], [0], [0, 0, 1, 0], [], []>} : vector<8x32xbf16>, vector<8x32xbf16>, vector<8x8xf32> -> vector<8x8xf32>
    "tpu.trace_stop"() : () -> ()
    %cst_27 = arith.constant 0.176776692 : f32
    %87 = vector.broadcast %cst_27 : f32 to vector<8x8xf32>
    %88 = arith.mulf %86, %87 : vector<8x8xf32>
    %cst_28 = arith.constant -1.000000e+09 : f32
    %89 = vector.broadcast %cst_28 : f32 to vector<8x8xf32>
    %90 = arith.select %10, %89, %88 : vector<8x8xi1>, vector<8x8xf32>
    %cst_29 = arith.constant dense<0xFF800000> : vector<8xf32>
    %91 = vector.multi_reduction <maximumf>, %90, %cst_29 [1] : vector<8x8xf32> to vector<8xf32>
    %92 = vector.shape_cast %91 : vector<8xf32> to vector<8x1xf32>
    %93 = vector.broadcast %92 : vector<8x1xf32> to vector<8x8xf32>
    %94 = arith.subf %90, %93 : vector<8x8xf32>
    %95 = math.exp %94 : vector<8x8xf32>
    %cst_30 = arith.constant dense<0.000000e+00> : vector<8xf32>
    %96 = vector.multi_reduction <add>, %95, %cst_30 [1] : vector<8x8xf32> to vector<8xf32>
    %97 = vector.shape_cast %96 : vector<8xf32> to vector<8x1xf32>
    %98 = tpu.reciprocal %97 {approx = true} : vector<8x1xf32> -> vector<8x1xf32>
    %99 = vector.broadcast %98 : vector<8x1xf32> to vector<8x8xf32>
    %100 = arith.mulf %95, %99 : vector<8x8xf32>
    %101 = arith.truncf %100 : vector<8x8xf32> to vector<8x8xbf16>
    %cst_31 = arith.constant dense<0.000000e+00> : vector<8x32xf32>
    %102 = tpu.matmul %101, %85, %cst_31 {dimension_numbers = #tpu.dot_dimension_numbers<[1], [0], [0], [1], [0, 0, 1, 1], [], []>} : vector<8x8xbf16>, vector<8x32xbf16>, vector<8x32xf32> -> vector<8x32xf32>
    %103 = tpu.concatenate %33, %56, %79, %102 in 1 : vector<8x32xf32>, vector<8x32xf32>, vector<8x32xf32>, vector<8x32xf32> -> vector<8x128xf32>
    %104 = arith.truncf %103 : vector<8x128xf32> to vector<8x128xbf16>
    %c0_32 = arith.constant 0 : index
    %c0_33 = arith.constant 0 : index
    %105 = vector.load %arg5[%c0_32, %c0_33] : memref<128x128xbf16, #tpu.memory_space<vmem>>, vector<128x128xbf16>
    %cst_34 = arith.constant dense<0.000000e+00> : vector<8x128xf32>
    %106 = tpu.matmul %104, %105, %cst_34 {dimension_numbers = #tpu.dot_dimension_numbers<[1], [0], [0], [1], [0, 0, 1, 1], [], []>} : vector<8x128xbf16>, vector<128x128xbf16>, vector<8x128xf32> -> vector<8x128xf32>
    %c0_35 = arith.constant 0 : index
    %c0_36 = arith.constant 0 : index
    %107 = vector.load %arg6[%c0_35, %c0_36] : memref<1x128xf32, #tpu.memory_space<vmem>>, vector<1x128xf32>
    %108 = vector.broadcast %107 : vector<1x128xf32> to vector<8x128xf32>
    %109 = arith.addf %106, %108 : vector<8x128xf32>
    %110 = arith.addf %109, %0 : vector<8x128xf32>
    %cst_37 = arith.constant dense<0.000000e+00> : vector<8xf32>
    %111 = vector.multi_reduction <add>, %110, %cst_37 [1] : vector<8x128xf32> to vector<8xf32>
    %112 = vector.shape_cast %111 : vector<8xf32> to vector<8x1xf32>
    %cst_38 = arith.constant 1.280000e+02 : f32
    %113 = vector.broadcast %cst_38 : f32 to vector<8x1xf32>
    %114 = arith.divf %112, %113 : vector<8x1xf32>
    %115 = vector.broadcast %114 : vector<8x1xf32> to vector<8x128xf32>
    %116 = arith.subf %110, %115 : vector<8x128xf32>
    %117 = arith.mulf %116, %116 : vector<8x128xf32>
    %cst_39 = arith.constant dense<0.000000e+00> : vector<8xf32>
    %118 = vector.multi_reduction <add>, %117, %cst_39 [1] : vector<8x128xf32> to vector<8xf32>
    %119 = vector.shape_cast %118 : vector<8xf32> to vector<8x1xf32>
    %cst_40 = arith.constant 1.280000e+02 : f32
    %120 = vector.broadcast %cst_40 : f32 to vector<8x1xf32>
    %121 = arith.divf %119, %120 : vector<8x1xf32>
    %cst_41 = arith.constant 9.99999974E-6 : f32
    %122 = vector.broadcast %cst_41 : f32 to vector<8x1xf32>
    %123 = arith.addf %121, %122 : vector<8x1xf32>
    %124 = math.rsqrt %123 : vector<8x1xf32>
    %125 = vector.broadcast %124 : vector<8x1xf32> to vector<8x128xf32>
    %126 = arith.mulf %116, %125 : vector<8x128xf32>
    %c0_42 = arith.constant 0 : index
    %c0_43 = arith.constant 0 : index
    %127 = vector.load %arg7[%c0_42, %c0_43] : memref<1x128xf32, #tpu.memory_space<vmem>>, vector<1x128xf32>
    %128 = vector.broadcast %127 : vector<1x128xf32> to vector<8x128xf32>
    %129 = arith.mulf %126, %128 : vector<8x128xf32>
    %c0_44 = arith.constant 0 : index
    %c0_45 = arith.constant 0 : index
    %130 = vector.load %arg8[%c0_44, %c0_45] : memref<1x128xf32, #tpu.memory_space<vmem>>, vector<1x128xf32>
    %131 = vector.broadcast %130 : vector<1x128xf32> to vector<8x128xf32>
    %132 = arith.addf %129, %131 : vector<8x128xf32>
    %133 = arith.truncf %132 : vector<8x128xf32> to vector<8x128xbf16>
    %c0_46 = arith.constant 0 : index
    %c0_47 = arith.constant 0 : index
    %134 = vector.load %arg9[%c0_46, %c0_47] : memref<128x512xbf16, #tpu.memory_space<vmem>>, vector<128x512xbf16>
    %cst_48 = arith.constant dense<0.000000e+00> : vector<8x512xf32>
    %135 = tpu.matmul %133, %134, %cst_48 {dimension_numbers = #tpu.dot_dimension_numbers<[1], [0], [0], [1], [0, 0, 1, 1], [], []>} : vector<8x128xbf16>, vector<128x512xbf16>, vector<8x512xf32> -> vector<8x512xf32>
    %c0_49 = arith.constant 0 : index
    %c0_50 = arith.constant 0 : index
    %136 = vector.load %arg10[%c0_49, %c0_50] : memref<1x512xf32, #tpu.memory_space<vmem>>, vector<1x512xf32>
    %137 = vector.broadcast %136 : vector<1x512xf32> to vector<8x512xf32>
    %138 = arith.addf %135, %137 : vector<8x512xf32>
    %cst_51 = arith.constant 5.000000e-01 : f32
    %139 = vector.broadcast %cst_51 : f32 to vector<8x512xf32>
    %140 = arith.mulf %138, %139 : vector<8x512xf32>
    %cst_52 = arith.constant 1.41421354 : f32
    %141 = vector.broadcast %cst_52 : f32 to vector<8x512xf32>
    %142 = arith.divf %138, %141 : vector<8x512xf32>
    %cst_53 = arith.constant 0.000000e+00 : f32
    %143 = vector.broadcast %cst_53 : f32 to vector<8x512xf32>
    %144 = arith.cmpf oge, %142, %143 : vector<8x512xf32>
    %cst_54 = arith.constant 1.000000e+00 : f32
    %cst_55 = arith.constant -1.000000e+00 : f32
    %145 = vector.broadcast %cst_54 : f32 to vector<8x512xf32>
    %146 = vector.broadcast %cst_55 : f32 to vector<8x512xf32>
    %147 = arith.select %144, %145, %146 : vector<8x512xi1>, vector<8x512xf32>
    %148 = math.absf %142 : vector<8x512xf32>
    %cst_56 = arith.constant 0.327591091 : f32
    %149 = vector.broadcast %cst_56 : f32 to vector<8x512xf32>
    %150 = arith.mulf %149, %148 : vector<8x512xf32>
    %cst_57 = arith.constant 1.000000e+00 : f32
    %151 = vector.broadcast %cst_57 : f32 to vector<8x512xf32>
    %152 = arith.addf %151, %150 : vector<8x512xf32>
    %cst_58 = arith.constant 1.000000e+00 : f32
    %153 = vector.broadcast %cst_58 : f32 to vector<8x512xf32>
    %154 = arith.divf %153, %152 : vector<8x512xf32>
    %cst_59 = arith.constant 1.06140542 : f32
    %155 = vector.broadcast %cst_59 : f32 to vector<8x512xf32>
    %156 = arith.mulf %155, %154 : vector<8x512xf32>
    %cst_60 = arith.constant -1.45315206 : f32
    %157 = vector.broadcast %cst_60 : f32 to vector<8x512xf32>
    %158 = arith.addf %156, %157 : vector<8x512xf32>
    %159 = arith.mulf %158, %154 : vector<8x512xf32>
    %cst_61 = arith.constant 1.42141378 : f32
    %160 = vector.broadcast %cst_61 : f32 to vector<8x512xf32>
    %161 = arith.addf %159, %160 : vector<8x512xf32>
    %162 = arith.mulf %161, %154 : vector<8x512xf32>
    %cst_62 = arith.constant -0.284496725 : f32
    %163 = vector.broadcast %cst_62 : f32 to vector<8x512xf32>
    %164 = arith.addf %162, %163 : vector<8x512xf32>
    %165 = arith.mulf %164, %154 : vector<8x512xf32>
    %cst_63 = arith.constant 0.254829586 : f32
    %166 = vector.broadcast %cst_63 : f32 to vector<8x512xf32>
    %167 = arith.addf %165, %166 : vector<8x512xf32>
    %168 = arith.mulf %167, %154 : vector<8x512xf32>
    %cst_64 = arith.constant 0.000000e+00 : f32
    %169 = vector.broadcast %cst_64 : f32 to vector<8x512xf32>
    %170 = arith.subf %169, %148 : vector<8x512xf32>
    %171 = arith.mulf %170, %148 : vector<8x512xf32>
    %172 = math.exp %171 : vector<8x512xf32>
    %173 = arith.mulf %168, %172 : vector<8x512xf32>
    %cst_65 = arith.constant 1.000000e+00 : f32
    %174 = vector.broadcast %cst_65 : f32 to vector<8x512xf32>
    %175 = arith.subf %174, %173 : vector<8x512xf32>
    %176 = arith.mulf %147, %175 : vector<8x512xf32>
    %cst_66 = arith.constant 1.000000e+00 : f32
    %177 = vector.broadcast %cst_66 : f32 to vector<8x512xf32>
    %178 = arith.addf %177, %176 : vector<8x512xf32>
    %179 = arith.mulf %140, %178 : vector<8x512xf32>
    %180 = arith.truncf %179 : vector<8x512xf32> to vector<8x512xbf16>
    %c0_67 = arith.constant 0 : index
    %c0_68 = arith.constant 0 : index
    %181 = vector.load %arg11[%c0_67, %c0_68] : memref<512x128xbf16, #tpu.memory_space<vmem>>, vector<512x128xbf16>
    %cst_69 = arith.constant dense<0.000000e+00> : vector<8x128xf32>
    %182 = tpu.matmul %180, %181, %cst_69 {dimension_numbers = #tpu.dot_dimension_numbers<[1], [0], [0], [1], [0, 0, 1, 1], [], []>} : vector<8x512xbf16>, vector<512x128xbf16>, vector<8x128xf32> -> vector<8x128xf32>
    %c0_70 = arith.constant 0 : index
    %c0_71 = arith.constant 0 : index
    %183 = vector.load %arg12[%c0_70, %c0_71] : memref<1x128xf32, #tpu.memory_space<vmem>>, vector<1x128xf32>
    %184 = vector.broadcast %183 : vector<1x128xf32> to vector<8x128xf32>
    %185 = arith.addf %182, %184 : vector<8x128xf32>
    %c0_72 = arith.constant 0 : index
    %c0_73 = arith.constant 0 : index
    %186 = vector.load %arg13[%c0_72, %c0_73] : memref<8x128xf32, #tpu.memory_space<vmem>>, vector<8x128xf32>
    tpu.vector_store %arg13[%c0_72, %c0_73], %185 {strides = array<i32>} : memref<8x128xf32, #tpu.memory_space<vmem>>, vector<8x128xf32>,
    return
  }
  func.func @transform_0(%arg0: i32) -> (i32, i32) {
    %c0_i32 = arith.constant 0 : i32
    %c0_i32_0 = arith.constant 0 : i32
    return %arg0, %c0_i32 : i32, i32
  }
  func.func @transform_1(%arg0: i32) -> (i32, i32, i32) {
    %c0_i32 = arith.constant 0 : i32
    %c0_i32_0 = arith.constant 0 : i32
    %c0_i32_1 = arith.constant 0 : i32
    return %arg0, %c0_i32, %c0_i32_0 : i32, i32, i32
  }
  func.func @transform_2(%arg0: i32) -> (i32, i32) {
    %c0_i32 = arith.constant 0 : i32
    %c0_i32_0 = arith.constant 0 : i32
    %c0_i32_1 = arith.constant 0 : i32
    return %c0_i32, %c0_i32_0 : i32, i32
  }
  func.func @transform_3(%arg0: i32) -> (i32, i32) {
    %c0_i32 = arith.constant 0 : i32
    %c0_i32_0 = arith.constant 0 : i32
    %c0_i32_1 = arith.constant 0 : i32
    return %c0_i32, %c0_i32_0 : i32, i32
  }
  func.func @transform_4(%arg0: i32) -> (i32, i32) {
    %c0_i32 = arith.constant 0 : i32
    %c0_i32_0 = arith.constant 0 : i32
    %c0_i32_1 = arith.constant 0 : i32
    return %c0_i32, %c0_i32_0 : i32, i32
  }
  func.func @transform_5(%arg0: i32) -> (i32, i32) {
    %c0_i32 = arith.constant 0 : i32
    %c0_i32_0 = arith.constant 0 : i32
    %c0_i32_1 = arith.constant 0 : i32
    return %c0_i32, %c0_i32_0 : i32, i32
  }
  func.func @transform_6(%arg0: i32) -> (i32, i32) {
    %c0_i32 = arith.constant 0 : i32
    %c0_i32_0 = arith.constant 0 : i32
    %c0_i32_1 = arith.constant 0 : i32
    return %c0_i32, %c0_i32_0 : i32, i32
  }
  func.func @transform_7(%arg0: i32) -> (i32, i32) {
    %c0_i32 = arith.constant 0 : i32
    %c0_i32_0 = arith.constant 0 : i32
    %c0_i32_1 = arith.constant 0 : i32
    return %c0_i32, %c0_i32_0 : i32, i32
  }
  func.func @transform_8(%arg0: i32) -> (i32, i32) {
    %c0_i32 = arith.constant 0 : i32
    %c0_i32_0 = arith.constant 0 : i32
    %c0_i32_1 = arith.constant 0 : i32
    return %c0_i32, %c0_i32_0 : i32, i32
  }
  func.func @transform_9(%arg0: i32) -> (i32, i32) {
    %c0_i32 = arith.constant 0 : i32
    %c0_i32_0 = arith.constant 0 : i32
    %c0_i32_1 = arith.constant 0 : i32
    return %c0_i32, %c0_i32_0 : i32, i32
  }
  func.func @transform_10(%arg0: i32) -> (i32, i32) {
    %c0_i32 = arith.constant 0 : i32
    %c0_i32_0 = arith.constant 0 : i32
    %c0_i32_1 = arith.constant 0 : i32
    return %c0_i32, %c0_i32_0 : i32, i32
  }
  func.func @transform_11(%arg0: i32) -> (i32, i32) {
    %c0_i32 = arith.constant 0 : i32
    %c0_i32_0 = arith.constant 0 : i32
    %c0_i32_1 = arith.constant 0 : i32
    return %c0_i32, %c0_i32_0 : i32, i32
  }
  func.func @transform_12(%arg0: i32) -> (i32, i32) {
    %c0_i32 = arith.constant 0 : i32
    %c0_i32_0 = arith.constant 0 : i32
    return %arg0, %c0_i32 : i32, i32
  }
}

</mosaic_0001>

<bundles_post_ra>
// kernel: encoder_layer.1
= control target key start
LH: loop header
LB: loop body
LE: loop exit
PB: predicated region body
PF: predicated region fallthrough
CT: control target
= control target key end

     0   :  { %17 = vsyncpa [#allocation3], 0  ;;  %s3334_s0 = inlined_call_operand.vmem [shape: f32[16,128], index: 0, kind: input, shape index: {}]   ;;  %s3335_s1 = inlined_call_operand.vmem [shape: s32[2,8,8], index: 1, kind: input, shape index: {}]   ;;  %s3336_s2 = inlined_call_operand.vmem [shape: bf16[128,384], index: 2, kind: input, shape index: {}]   ;;  %s3337_s3 = inlined_call_operand.vmem [shape: f32[1,384], index: 3, kind: input, shape index: {}]   ;;  %s3338_s4 = inlined_call_operand.vmem [shape: bf16[128,128], index: 4, kind: input, shape index: {}]   ;;  %s3339_s5 = inlined_call_operand.vmem [shape: f32[1,128], index: 5, kind: input, shape index: {}]   ;;  %s3340_s6 = inlined_call_operand.vmem [shape: f32[1,128], index: 6, kind: input, shape index: {}]   ;;  %s3341_s7 = inlined_call_operand.vmem [shape: f32[1,128], index: 7, kind: input, shape index: {}]   ;;  %s3342_s8 = inlined_call_operand.vmem [shape: bf16[128,512], index: 8, kind: input, shape index: {}]   ;;  %s3343_s9 = inlined_call_operand.vmem [shape: f32[1,512], index: 9, kind: input, shape index: {}]   ;;  %s3344_s10 = inlined_call_operand.vmem [shape: bf16[512,128], index: 10, kind: input, shape index: {}]   ;;  %s3345_s11 = inlined_call_operand.vmem [shape: f32[1,128], index: 11, kind: input, shape index: {}]   ;;  %s3346_s12 = inlined_call_operand.hbm [shape: f32[16,128], index: 12, kind: output, shape index: {}]  }
   0x1   :  { %19 = vsyncpa [#allocation3 + $0x1], 0  ;;  %s2759_s21 = smov 0   ;;  %s2761_s22 = smov 0  }
   0x2   :  { %s2763_s23 = smov 0   ;;  %s2765_s24 = smov 0  }
   0x3 LB: > { %3348 = sst [smem:[#allocation5_spill]] %s2680_s23  ;;  %s2780_s25 = sadd.s32 4294967295, %s2684_s24   ;;  %s2684_s24 = sphi %s2765_s24, %s3358_s24   ;;  %s2680_s23 = sphi %s2763_s23, %s3355_s23   ;;  %s2676_s22 = sphi %s2761_s22, %s3357_s22   ;;  %s2672_s21 = sphi %s2759_s21, %s3356_s21  }
   0x4   : > { %s2137_s26 = sadd.s32 4294967294, %s2684_s24   ;;  %s2784_s27 = sadd.s32 1, %s2684_s24  }
   0x5   : > { %s294_s28 = sadd.s32 1, %s2680_s23  ;;  %s291_s29 = ssub.s32 %s2684_s24, %s2784_s27 }
   0x6   : > { %p304_p0 = scmp.ne.s32.totalorder %s2680_s23, %s2676_s22  ;;  %p292_p1 = scmp.eq.s32.totalorder %s291_s29, 0 }
   0x7   : > { %p305_p2 = scmp.eq.s32.totalorder %s2780_s25, 1  ;;  %p310_p3 = scmp.ne.s32.totalorder %s2676_s22, %s2672_s21 }
   0x8   : > { %p311_p4 = scmp.eq.s32.totalorder %s2137_s26, 1  ;;  %p2140_p7 = scmp.ge.s32.totalorder %s2684_s24, 1 }
   0x9   : > { %s2795_s30 = scalar_select %p292_p1, %s2680_s23, %s294_s28  }
   0xa   : > { %p2797_p5 = por %p305_p2, %p304_p0  ;;  %p2801_p6 = por %p311_p4, %p310_p3 }
   0xb   : > { %3349 = sst [smem:[#allocation6_spill]] %s2795_s30  ;;  %p373_p8 = scmp.lt.s32.totalorder %s2684_s24, 3 }
   0xd   : > { %p374_p9 = pnand %p2140_p7, %p373_p8 }
   0xe   : > { %v2468_v0 = vld [vmem:[%s3336_s2 + $0x4] ss:$12 sps:$4 sm:$0xff] (!%p374_p9)   ;;  %v2470_v1 = vld [vmem:[%s3336_s2] ss:$12 sps:$4 sm:$0xff] (!%p374_p9)   ;;  %v2686_v2 = vmov (!%p374_p9), 0   ;;  %v2687_v4 = vmov (!%p374_p9), 0.0   ;;  %v463_v28 = vlaneseq (!%p374_p9) }
   0xf   : > { %377 = sbr.rel (%p374_p9) target bundleno = 2724 (0xaa4), region = 68  ;;  %638 = vmatprep.mubr.bf16.mxu0 (!%p374_p9), %v2686_v2  ;;  %606 = vmatprep.subr.bf16.mxu0 (!%p374_p9), %v2468_v0  ;;  %v2471_v3 = vld [vmem:[%s3336_s2 + $0x1c] ss:$12 sps:$4 sm:$0xff] (!%p374_p9)   ;;  %v2473_v5 = vld [vmem:[%s3336_s2 + $0x18] ss:$12 sps:$4 sm:$0xff] (!%p374_p9)   ;;  %p418_p10 = scmp.lt.s32.totalorder (!%p374_p9), %s2780_s25, 1 }
  0x10   : > { %2334 = vmatprep.subr.bf16.mxu1 (!%p374_p9), %v2687_v4  ;;  %607 = vmatpush1.bf16.msra.mxu0 (!%p374_p9), %v2470_v1  ;;  %v2474_v6 = vld [vmem:[%s3336_s2 + $0x34] ss:$12 sps:$4 sm:$0xff] (!%p374_p9)   ;;  %v2476_v7 = vld [vmem:[%s3336_s2 + $0x30] ss:$12 sps:$4 sm:$0xff] (!%p374_p9)   ;;  %v2477_v8 = vld [vmem:[%s3336_s2 + $0x4c] ss:$12 sps:$4 sm:$0xff] (!%p374_p9)  }
  0x11   : > { %608 = vmatprep.subr.bf16.mxu0 (!%p374_p9), %v2471_v3  ;;  %v2479_v9 = vld [vmem:[%s3336_s2 + $0x48] ss:$12 sps:$4 sm:$0xff] (!%p374_p9)   ;;  %v2480_v11 = vld [vmem:[%s3336_s2 + $0x64] ss:$12 sps:$4 sm:$0xff] (!%p374_p9)   ;;  %v2493_v12 = vld [vmem:[%s3336_s2 + $0x20] ss:$12 sps:$4 sm:$0xff] (!%p374_p9)  }
  0x12   : > { %v2492_v10 = vld [vmem:[%s3336_s2 + $0x8] ss:$12 sps:$4 sm:$0xff] (!%p374_p9)   ;;  %v2482_v13 = vld [vmem:[%s3336_s2 + $0x60] ss:$12 sps:$4 sm:$0xff] (!%p374_p9)   ;;  %v2485_v15 = vld [vmem:[%s3336_s2 + $0x78] ss:$12 sps:$4 sm:$0xff] (!%p374_p9)  }
  0x13   : > { %2335 = vmatpush3.bf16.msra.mxu1 (!%p374_p9), %v2492_v10  ;;  %v2483_v14 = vld [vmem:[%s3336_s2 + $0x7c] ss:$12 sps:$4 sm:$0xff] (!%p374_p9)   ;;  %v2494_v16 = vld [vmem:[%s3336_s2 + $0x38] ss:$12 sps:$4 sm:$0xff] (!%p374_p9)   ;;  %v2486_v17 = vld [vmem:[%s3336_s2 + $0x94] ss:$12 sps:$4 sm:$0xff] (!%p374_p9)  }
  0x14   : > { %609 = vmatpush1.bf16.msra.mxu0 (!%p374_p9), %v2473_v5  ;;  %2336 = vmatprep.subr.bf16.mxu1 (!%p374_p9), %v2687_v4  ;;  %v2495_v18 = vld [vmem:[%s3336_s2 + $0x50] ss:$12 sps:$4 sm:$0xff] (!%p374_p9)   ;;  %v2489_v20 = vld [vmem:[%s3336_s2 + $0xac] ss:$12 sps:$4 sm:$0xff] (!%p374_p9)   ;;  %v2496_v21 = vld [vmem:[%s3336_s2 + $0x68] ss:$12 sps:$4 sm:$0xff] (!%p374_p9)  }
  0x15   : > { %610 = vmatprep.subr.bf16.mxu0 (!%p374_p9), %v2474_v6  ;;  %v2488_v19 = vld [vmem:[%s3336_s2 + $0x90] ss:$12 sps:$4 sm:$0xff] (!%p374_p9)   ;;  %v2491_v22 = vld [vmem:[%s3336_s2 + $0xa8] ss:$12 sps:$4 sm:$0xff] (!%p374_p9)   ;;  %v2497_v24 = vld [vmem:[%s3336_s2 + $0x80] ss:$12 sps:$4 sm:$0xff] (!%p374_p9)  }
  0x16   : > { %s2835_s26 = scalar_select %p418_p10, %s2780_s25, 1  ;;  %v2498_v26 = vld [vmem:[%s3336_s2 + $0x98] ss:$12 sps:$4 sm:$0xff]   ;;  %v2499_v27 = vld [vmem:[%s3336_s2 + $0xb0] ss:$12 sps:$4 sm:$0xff]   ;;  %vm2688_vm0 = vmmov 0  }
  0x17   : > { %2337 = vmatpush3.bf16.msra.mxu1 %v2493_v12  ;;  %2350 = vmatprep.mubr.msk.bf16.mxu1 %vm2688_vm0, %v2687_v4  ;;  %v2910_v29 = vshrl.u32 %v463_v28, 7  ;;  %v461_v31 = vld [vmem:[%s3337_s3] sm:$0x7]  ;;  %vm692_vm1 = vcmask 261120   ;;  %s2689_s28 = smov 96   ;;  %s2690_s29 = smov 64  }
  0x18   : > { %611 = vmatpush1.bf16.msra.mxu0 %v2476_v7  ;;  %2338 = vmatprep.subr.bf16.mxu1 %v2687_v4  ;;  %s3352_s17 = sshll.u32 %s2835_s26, 3  ;;  %s2691_s15 = smov 32   ;;  %vm757_vm2 = vcmask 1043456   ;;  %vm741_vm4 = vcmask 64512   ;;  %vm1153_vm5 = vcmask 523264   ;;  %vm1155_vm6 = vcmask 785408  }
  0x19   : > { %612 = vmatprep.subr.bf16.mxu0 %v2477_v8  ;;  %s421_s18 = scalar_lea.vmem %s3334_s0, %s3352_s17  ;;  %v469_v30 = vsub.s32 1, %v2910_v29  ;;  %v465_v32 = vsub.s32 0, %v2910_v29  ;;  %v473_v44 = vsub.s32 2, %v2910_v29  ;;  %s3353_s16 = sshll.u32 %s2835_s26, 3 }
  0x1a   : > { %v2885_v23 = vld [vmem:[%s421_s18] sm:$0xff]  ;;  %s425_s30 = scalar_lea.vmem %s3335_s1, %s3353_s16  ;;  %s415_s18 = sand.u32 1, %s2676_s22  }
  0x1b   : > { %2339 = vmatpush3.bf16.msra.mxu1 %v2494_v16  ;;  %v428_v25 = vpack.c.bf16 %v2885_v23, %v2885_v23  ;;  %v470_v33 = vrot.slane %v461_v31, %v469_v30  ;;  %v466_v34 = vrot.slane %v461_v31, %v465_v32  ;;  %v474_v45 = vrot.slane %v461_v31, %v473_v44  ;;  %v2944_v53 = vld [vmem:[%s425_s30] sm:$0xff]  ;;  %s2141_s19 = sshll.u32 %s415_s18, 3  ;;  %s2253_s17 = sshll.u32 %s2780_s25, 7 }
  0x1c   : > { %613 = vmatpush1.bf16.msra.mxu0 %v2479_v9  ;;  %2340 = vmatprep.subr.bf16.mxu1 %v2687_v4  ;;  %vm688_vm3 = vcmp.ne.s32.totalorder %v2944_v53, 0  ;;  %s417_s23 = scalar_lea.vmem [#allocation2], %s2141_s19  ;;  %s2053_s26 = scalar_lea.sflag [#allocation3], %s415_s18 }
  0x1d   : > { %614 = vmatprep.subr.bf16.mxu0 %v2480_v11  ;;  %s2066_s30 = sshll.u32 %s417_s23, 4  ;;  %s2693_s19 = smov [#allocation2]   ;;  %s3294_s30 = int_to_ptr.vmem [resolvable:$true] %s2066_s30 }
  0x1e   : > { %s2622_s25 = scalar_lea.vmem %s3294_s30, 128  ;;  %s2626_s20 = sshll.u32 %s2693_s19, 4  ;;  %s2627_s20 = int_to_ptr.vmem [resolvable:$false] %s2626_s20 }
  0x1f   : > { %2341 = vmatpush3.bf16.msra.mxu1 %v2495_v18  ;;  %p2623_p11 = scmp.ne.s32.totalorder %s3294_s30, %s2622_s25  ;;  %s2628_s16 = scalar_lea.vmem %s2627_s20, 256 }
  0x20   : > { %615 = vmatpush1.bf16.msra.mxu0 %v2482_v13  ;;  %2342 = vmatprep.subr.bf16.mxu1 %v2687_v4  ;;  %p2629_p0 = scmp.lt.s32.totalorder %s3294_s30, %s2627_s20  ;;  %p2630_p1 = scmp.lt.s32.totalorder %s2628_s16, %s2622_s25 }
  0x21   : > { %616 = vmatprep.subr.bf16.mxu0 %v2483_v14  ;;  %p2624_p12 = pnand %p2623_p11, %p2797_p5 }
  0x22   : > { %p2631_p2 = por %p2630_p1, %p2629_p0 }
  0x23   : > { %2343 = vmatpush3.bf16.msra.mxu1 %v2496_v21  ;;  %p2625_p13 = pneg %p2624_p12 }
  0x24   : > { %617 = vmatpush1.bf16.msra.mxu0 %v2485_v15  ;;  %2344 = vmatprep.subr.bf16.mxu1 %v2687_v4 }
  0x25   : > { %618 = vmatprep.subr.bf16.mxu0 %v2486_v17  ;;  %p2632_p3 = pnand %p2631_p2, %p2625_p13 }
  0x27   : > { %2345 = vmatpush3.bf16.msra.mxu1 %v2497_v24 }
  0x28   : > { %619 = vmatpush1.bf16.msra.mxu0 %v2488_v19  ;;  %2346 = vmatprep.subr.bf16.mxu1 %v2687_v4 }
  0x29   : > { %620 = vmatprep.subr.bf16.mxu0 %v2489_v20 }
  0x2b   : > { %2347 = vmatpush3.bf16.msra.mxu1 %v2498_v26 }
  0x2c   : > { %621 = vmatpush1.bf16.msra.mxu0 %v2491_v22  ;;  %2348 = vmatprep.subr.bf16.mxu1 %v2687_v4 }
  0x2d   : > { %2378 = vmatprep.subr.bf16.mxu0 %v2687_v4 }
  0x2f   : > { %639 = vmatmul.mubr.bf16.vlgmr.msra.gmra.mrb[0].mxu0 %v428_v25  ;;  %2349 = vmatpush3.bf16.msra.mxu1 %v2499_v27 }
  0x30   : > { %2354 = vmatprep.subr.bf16.mxu1 %v2687_v4  ;;  %2380 = vmatprep.mubr.msk.bf16.mxu0 %vm2688_vm0, %v2687_v4 }
  0x32   : > { %2351 = vmatmul.mubr.bf16.vlgmr.msra.gmra.mrb[0].mxu1 %v428_v25 }
  0x33   : > { %2356 = vmatprep.mubr.msk.bf16.mxu1 %vm2688_vm0, %v2687_v4 }
 0x102   : > { %v640_v35 = vpop.f32.mrb[0].mxu0 }
 0x103   : > { %v642_v36 = vpop.f32.mrb[1].mxu0  ;;  %v641_v40 = vadd.f32 %v640_v35, %v466_v34 }
 0x104   : > { %v643_v37 = vadd.f32 %v642_v36, %v470_v33  ;;  %v644_v38 = vpop.f32.mrb[2].mxu0 }
 0x105   : > { %v645_v39 = vpop.f32.mrb[3].mxu0  ;;  %v689_v43 = vpack.c.bf16 %v641_v40, %v641_v40  ;;  %v681_v46 = vpop.f32.mrb[0].mxu1 }
 0x106   : > { %v690_v41 = vpack.c.bf16 %v643_v37, %v643_v37  ;;  %v682_v47 = vadd.f32 %v681_v46, %v474_v45  ;;  %v2352_v48 = vpop.f32.mrb[1].mxu1 }
 0x107   : > { %v684_v49 = vpop.f32.mrb[2].mxu1 }
 0x108   : > { %805 = vrot.lane.b32.xlu1 %v690_v41, %s2689_s28  ;;  %v697_v42 = vsel %vm692_vm1, %v690_v41, 0  ;;  %v2934_v50 = vpack.c.bf16 %v682_v47, %v682_v47  ;;  %v2353_v51 = vpop.f32.mrb[3].mxu1 }
 0x109   : > { %2355 = vmatpush3.bf16.xpose.msra.mxu1 %v697_v42 }
 0x10a   : > { %2360 = vmatprep.subr.bf16.mxu1 %v2687_v4  ;;  %v759_v52 = vsel %vm757_vm2, %v2934_v50, 0 }
 0x10c   : > { %802 = vrot.lane.b32.xlu1 %v689_v43, %s2689_s28 }
 0x110   : > { %916 = vrot.lane.b32.xlu1 %v689_v43, %s2690_s29  ;;  %2357 = vmatmul.mubr.msk.bf16.vlgmr.msra.gmra.mrb[4].mxu1 %vm692_vm1, %v689_v43 }
 0x111   : > { %2362 = vmatprep.mubr.msk.bf16.mxu1 %vm2688_vm0, %v2687_v4  ;;  %2361 = vmatpush3.bf16.msra.mxu1 %v759_v52 }
 0x112   : > { %2366 = vmatprep.subr.bf16.mxu1 %v2687_v4 }
 0x114   : > { %1030 = vrot.lane.b32.xlu1 %v690_v41, %s2691_s15 }
 0x118   : > { %1028 = vrot.lane.b32.xlu1 %v689_v43, %s2691_s15 }
 0x17a   : > { %v806_v3 = vpop.permute.xlu1 %805 }
 0x17b   : > { %v811_v15 = vsel %vm692_vm1, %v806_v3, 0 }
 0x17e   : > { %v803_v5 = vpop.permute.xlu1 %802 }
 0x182   : > { %v917_v7 = vpop.permute.xlu1 %916 }
 0x186   : > { %v1031_v10 = vpop.permute.xlu1 %1030 }
 0x187   : > { %v1036_v13 = vsel %vm692_vm1, %v1031_v10, 0 }
 0x18a   : > { %v1029_v16 = vpop.permute.xlu1 %1028 }
 0x1e3   : > { %v733_v54 = vpop.f32.mrb[4].mxu1 }
 0x1e4   : > { %v739_v55 = vmul.f32 0.17677669, %v733_v54  ;;  %v2358_v56 = vpop.f32.mrb[5].mxu1 }
 0x1e5   : > { %v736_v57 = vpop.f32.mrb[6].mxu1 }
 0x1e6   : > { %v2359_v58 = vpop.f32.mrb[7].mxu1  ;;  %v740_v59 = vsel %vm688_vm3, -1e+09, %v739_v55 }
 0x1e7   : > { %v742_v60 = vsel %vm741_vm4, %v740_v59, -inf }
 0x1e8   : > { %743 = vmax.xlane.f32.xlu0 %v742_v60 }
 0x275   : > { %v744_v61 = vpop.xlane.xlu0 %743 }
 0x276   : > { %v745_v62 = vsub.f32 %v740_v59, %v744_v61 }
 0x278   : > { %v746_v63 = vmul.f32 1.442695, %v745_v62 }
 0x27a   : > { %2588 = vpow2.f32 %v746_v63 }
 0x284   : > { %v2589_v0 = vpop.eup %2588 }
 0x285   : > { %v748_v1 = vsel %vm741_vm4, %v2589_v0, 0.0 }
 0x286   : > { %749 = vadd.xlane.f32.xlu0 %v748_v1 }
 0x29c   : > { %918 = vrot.lane.b32.xlu0 %v690_v41, %s2690_s29 }
 0x313   : > { %v750_v6 = vpop.xlane.xlu0 %749 }
 0x314   : > { %2590 = vrcp.f32 %v750_v6 }
 0x317   : > { %v919_v8 = vpop.permute.xlu0 %918 }
 0x318   : > { %v924_v9 = vsel %vm692_vm1, %v919_v8, 0 }
 0x319   : > { %2379 = vmatpush3.bf16.xpose.msra.mxu0 %v924_v9 }
 0x31a   : > { %2390 = vmatprep.subr.bf16.mxu0 %v2687_v4 }
 0x31e   : > { %v2591_v11 = vpop.eup %2590 }
 0x31f   : > { %v752_v12 = vmul.f32 %v2591_v11, %v2589_v0 }
 0x320   : > { %2381 = vmatmul.mubr.msk.bf16.vlgmr.msra.gmra.mrb[4].mxu0 %vm692_vm1, %v917_v7 }
 0x321   : > { %2391 = vmatpush3.bf16.xpose.msra.mxu0 %v1036_v13  ;;  %v753_v14 = vpack.c.bf16 %v752_v12, %v752_v12  ;;  %2392 = vmatprep.mubr.msk.bf16.mxu0 %vm2688_vm0, %v2687_v4 }
 0x322   : > { %2402 = vmatprep.subr.bf16.mxu0 %v2687_v4 }
 0x323   : > { %2363 = vmatmul.mubr.msk.bf16.vlgmr.msra.gmra.mrb[8].mxu1 %vm741_vm4, %v753_v14 }
 0x324   : > { %2367 = vmatpush3.bf16.xpose.msra.mxu1 %v811_v15  ;;  %2368 = vmatprep.mubr.msk.bf16.mxu1 %vm2688_vm0, %v2687_v4 }
 0x325   : > { %2372 = vmatprep.subr.bf16.mxu1 %v2687_v4 }
 0x328   : > { %2393 = vmatmul.mubr.msk.bf16.vlgmr.msra.gmra.mrb[8].mxu0 %vm692_vm1, %v1029_v16 }
 0x329   : > { %2418 = vmatprep.mubr.msk.bf16.mxu0 %vm2688_vm0, %v2687_v4 }
 0x32b   : > { %2369 = vmatmul.mubr.msk.bf16.vlgmr.msra.gmra.mrb[12].mxu1 %vm692_vm1, %v803_v5 }
 0x32c   : > { %2374 = vmatprep.mubr.msk.bf16.mxu1 %vm2688_vm0, %v2687_v4 }
 0x3f3   : > { %v960_v17 = vpop.f32.mrb[4].mxu0 }
 0x3f4   : > { %v966_v18 = vmul.f32 0.17677669, %v960_v17  ;;  %v2382_v19 = vpop.f32.mrb[5].mxu0 }
 0x3f5   : > { %v963_v20 = vpop.f32.mrb[6].mxu0  ;;  %v2501_v19 = vld [vmem:[%s3338_s4 + $0x8] sm:$0xff]  }
 0x3f6   : > { %v2970_v21 = vpop.f32.mrb[8].mxu1  ;;  %v2383_v22 = vpop.f32.mrb[7].mxu0  ;;  %v967_v24 = vsel %vm688_vm3, -1e+09, %v966_v18  ;;  %v2500_v18 = vld [vmem:[%s3338_s4] sm:$0xff]   ;;  %v2502_v20 = vld [vmem:[%s3338_s4 + $0x10] sm:$0xff]  }
 0x3f7   : > { %v2364_v25 = vpop.f32.mrb[9].mxu1  ;;  %v968_v26 = vsel %vm741_vm4, %v967_v24, -inf  ;;  %2403 = vmatpush3.bf16.msra.mxu0 %v2500_v18  ;;  %v2503_v22 = vld [vmem:[%s3338_s4 + $0x18] sm:$0xff]   ;;  %v2538_v18 = vld [vmem:[%s3342_s8 + $0xa0] ss:$16 sps:$4 sm:$0xff]  }
 0x3f8   : > { %969 = vmax.xlane.f32.xlu0 %v968_v26  ;;  %v798_v27 = vpop.f32.mrb[10].mxu1  ;;  %2404 = vmatprep.subr.bf16.mxu0 %v2687_v4  ;;  %v2505_v25 = vld [vmem:[%s3338_s4 + $0x28] sm:$0xff]   ;;  %v2506_v26 = vld [vmem:[%s3338_s4 + $0x30] sm:$0xff]  }
 0x3f9   : > { %v2365_v28 = vpop.f32.mrb[11].mxu1 }
 0x3fb   : > { %v1072_v31 = vpop.f32.mrb[8].mxu0  ;;  %2405 = vmatpush3.bf16.msra.mxu0 %v2501_v19  ;;  %v2541_v19 = vld [vmem:[%s3342_s8 + $0xa8] ss:$16 sps:$4 sm:$0xff]  }
 0x3fc   : > { %v2394_v33 = vpop.f32.mrb[9].mxu0  ;;  %v1078_v37 = vmul.f32 0.17677669, %v1072_v31  ;;  %2406 = vmatprep.subr.bf16.mxu0 %v2687_v4 }
 0x3fd   : > { %v1075_v34 = vpop.f32.mrb[10].mxu0 }
 0x3fe   : > { %v847_v35 = vpop.f32.mrb[12].mxu1  ;;  %v2395_v36 = vpop.f32.mrb[11].mxu0  ;;  %v1079_v45 = vsel %vm688_vm3, -1e+09, %v1078_v37  ;;  %v2507_v34 = vld [vmem:[%s3338_s4 + $0x38] sm:$0xff]  }
 0x3ff   : > { %v853_v38 = vmul.f32 0.17677669, %v847_v35  ;;  %v2370_v39 = vpop.f32.mrb[13].mxu1  ;;  %v1080_v46 = vsel %vm741_vm4, %v1079_v45, -inf  ;;  %2407 = vmatpush3.bf16.msra.mxu0 %v2502_v20  ;;  %v2546_v20 = vld [vmem:[%s3342_s8 + $0xc4] ss:$16 sps:$4 sm:$0xff]  }
 0x400   : > { %v850_v40 = vpop.f32.mrb[14].mxu1  ;;  %2408 = vmatprep.subr.bf16.mxu0 %v2687_v4 }
 0x401   : > { %v2371_v41 = vpop.f32.mrb[15].mxu1  ;;  %v854_v42 = vsel %vm688_vm3, -1e+09, %v853_v38 }
 0x402   : > { %v855_v43 = vsel %vm741_vm4, %v854_v42, -inf }
 0x403   : > { %856 = vmax.xlane.f32.xlu1 %v855_v43  ;;  %2409 = vmatpush3.bf16.msra.mxu0 %v2503_v22  ;;  %v2549_v22 = vld [vmem:[%s3342_s8 + $0xcc] ss:$16 sps:$4 sm:$0xff]  }
 0x404   : > { %2410 = vmatprep.subr.bf16.mxu0 %v2687_v4 }
 0x407   : > { %1081 = vmax.xlane.f32.xlu1 %v1080_v46 }
 0x485   : > { %v970_v47 = vpop.xlane.xlu0 %969 }
 0x486   : > { %v971_v48 = vsub.f32 %v967_v24, %v970_v47  ;;  %v2504_v24 = vld [vmem:[%s3338_s4 + $0x20] sm:$0xff]  }
 0x487   : > { %2411 = vmatpush3.bf16.msra.mxu0 %v2504_v24  ;;  %v2544_v24 = vld [vmem:[%s3342_s8 + $0xc0] ss:$16 sps:$4 sm:$0xff]  }
 0x488   : > { %v972_v49 = vmul.f32 1.442695, %v971_v48  ;;  %2412 = vmatprep.subr.bf16.mxu0 %v2687_v4 }
 0x48a   : > { %2592 = vpow2.f32 %v972_v49 }
 0x48b   : > { %2413 = vmatpush3.bf16.msra.mxu0 %v2505_v25  ;;  %v2547_v25 = vld [vmem:[%s3342_s8 + $0xc8] ss:$16 sps:$4 sm:$0xff]  }
 0x48c   : > { %2414 = vmatprep.subr.bf16.mxu0 %v2687_v4 }
 0x48f   : > { %2415 = vmatpush3.bf16.msra.mxu0 %v2506_v26  ;;  %v2552_v26 = vld [vmem:[%s3342_s8 + $0xe4] ss:$16 sps:$4 sm:$0xff]  }
 0x490   : > { %v857_v51 = vpop.xlane.xlu1 %856  ;;  %2416 = vmatprep.subr.bf16.mxu0 %v2687_v4 }
 0x491   : > { %v858_v52 = vsub.f32 %v854_v42, %v857_v51  ;;  %v2176_v51 = vld [vmem:[%s3339_s5] ss:$0 sm:$0xff] }
 0x493   : > { %v859_v58 = vmul.f32 1.442695, %v858_v52  ;;  %2417 = vmatpush3.bf16.msra.mxu0 %v2507_v34 }
 0x494   : > { %v2593_v54 = vpop.eup %2592  ;;  %v1082_v55 = vpop.xlane.xlu1 %1081 }
 0x495   : > { %v1083_v56 = vsub.f32 %v1079_v45, %v1082_v55  ;;  %v974_v57 = vsel %vm741_vm4, %v2593_v54, 0.0 }
 0x496   : > { %975 = vadd.xlane.f32.xlu0 %v974_v57 }
 0x497   : > { %v1084_v59 = vmul.f32 1.442695, %v1083_v56 }
 0x499   : > { %2594 = vpow2.f32 %v1084_v59  ;;  %v2511_v59 = vld [vmem:[%s3342_s8 + $0x8] ss:$16 sps:$4 sm:$0xff]  }
 0x49a   : > { %2596 = vpow2.f32 %v859_v58 }
 0x4a3   : > { %v2595_v53 = vpop.eup %2594 }
 0x4a4   : > { %v1086_v60 = vsel %vm741_vm4, %v2595_v53, 0.0  ;;  %v2597_v61 = vpop.eup %2596 }
 0x4a5   : > { %1087 = vadd.xlane.f32.xlu1 %v1086_v60  ;;  %v861_v62 = vsel %vm741_vm4, %v2597_v61, 0.0  ;;  %v2519_v60 = vld [vmem:[%s3342_s8 + $0x2c] ss:$16 sps:$4 sm:$0xff]  }
 0x4a9   : > { %862 = vadd.xlane.f32.xlu1 %v861_v62  ;;  %v2517_v62 = vld [vmem:[%s3342_s8 + $0x28] ss:$16 sps:$4 sm:$0xff]  }
 0x4ac   : > { %868 = vrot.lane.b32.xlu0 %v2934_v50, %s2689_s28 }
 0x4ba   : > { %980 = vrot.lane.b32.xlu1 %v2934_v50, %s2690_s29 }
 0x4be   : > { %1092 = vrot.lane.b32.xlu1 %v2934_v50, %s2691_s15 }
 0x523   : > { %v976_v63 = vpop.xlane.xlu0 %975 }
 0x527   : > { %v869_v0 = vpop.permute.xlu0 %868 }
 0x528   : > { %v874_v1 = vsel %vm757_vm2, %v869_v0, 0  ;;  %v2525_v0 = vld [vmem:[%s3342_s8 + $0x4c] ss:$16 sps:$4 sm:$0xff]  }
 0x529   : > { %2373 = vmatpush3.bf16.msra.mxu1 %v874_v1  ;;  %v2520_v1 = vld [vmem:[%s3342_s8 + $0x40] ss:$16 sps:$4 sm:$0xff]  }
 0x52a   : > { %2384 = vmatprep.subr.bf16.mxu1 %v2687_v4 }
 0x532   : > { %v1088_v3 = vpop.xlane.xlu1 %1087 }
 0x536   : > { %v863_v5 = vpop.xlane.xlu1 %862 }
 0x537   : > { %2598 = vrcp.f32 %v863_v5 }
 0x538   : > { %2600 = vrcp.f32 %v976_v63  ;;  %v2522_v63 = vld [vmem:[%s3342_s8 + $0x44] ss:$16 sps:$4 sm:$0xff]  }
 0x539   : > { %2602 = vrcp.f32 %v1088_v3  ;;  %v2523_v3 = vld [vmem:[%s3342_s8 + $0x48] ss:$16 sps:$4 sm:$0xff]  }
 0x53a   : > { %v981_v8 = vpop.permute.xlu1 %980 }
 0x53b   : > { %v986_v11 = vsel %vm757_vm2, %v981_v8, 0 }
 0x53e   : > { %v1093_v12 = vpop.permute.xlu1 %1092 }
 0x53f   : > { %v1098_v15 = vsel %vm757_vm2, %v1093_v12, 0  ;;  %v2534_v12 = vld [vmem:[%s3342_s8 + $0x84] ss:$16 sps:$4 sm:$0xff]  }
 0x541   : > { %v2599_v6 = vpop.eup %2598 }
 0x542   : > { %v865_v7 = vmul.f32 %v2599_v6, %v2597_v61  ;;  %v2601_v10 = vpop.eup %2600  ;;  %v2514_v61 = vld [vmem:[%s3342_s8 + $0x20] ss:$16 sps:$4 sm:$0xff]  }
 0x543   : > { %v978_v50 = vmul.f32 %v2601_v10, %v2593_v54  ;;  %v2603_v14 = vpop.eup %2602  ;;  %v2531_v10 = vld [vmem:[%s3342_s8 + $0x6c] ss:$16 sps:$4 sm:$0xff]  }
 0x544   : > { %v866_v9 = vpack.c.bf16 %v865_v7, %v865_v7  ;;  %v1090_v16 = vmul.f32 %v2603_v14, %v2595_v53  ;;  %v2513_v53 = vld [vmem:[%s3342_s8 + $0xc] ss:$16 sps:$4 sm:$0xff]   ;;  %v2532_v14 = vld [vmem:[%s3342_s8 + $0x80] ss:$16 sps:$4 sm:$0xff]  }
 0x545   : > { %v979_v13 = vpack.c.bf16 %v978_v50, %v978_v50  ;;  %1554 = vmatprep.subr.bf16.mxu0 %v2513_v53  ;;  %v2529_v50 = vld [vmem:[%s3342_s8 + $0x68] ss:$16 sps:$4 sm:$0xff]   ;;  %v2573_v53 = vld [vmem:[%s3344_s10 + $0xe0] sm:$0xff]  }
 0x546   : > { %2375 = vmatmul.mubr.msk.bf16.vlgmr.msra.gmra.mrb[16].mxu1 %vm741_vm4, %v866_v9  ;;  %v1091_v17 = vpack.c.bf16 %v1090_v16, %v1090_v16  ;;  %v2528_v9 = vld [vmem:[%s3342_s8 + $0x64] ss:$16 sps:$4 sm:$0xff]  }
 0x547   : > { %2385 = vmatpush3.bf16.msra.mxu1 %v986_v11  ;;  %2386 = vmatprep.mubr.msk.bf16.mxu1 %vm2688_vm0, %v2687_v4  ;;  %v2526_v11 = vld [vmem:[%s3342_s8 + $0x60] ss:$16 sps:$4 sm:$0xff]   ;;  %v2540_v16 = vld [vmem:[%s3342_s8 + $0xa4] ss:$16 sps:$4 sm:$0xff]  }
 0x548   : > { %2396 = vmatprep.subr.bf16.mxu1 %v2687_v4 }
 0x54e   : > { %2387 = vmatmul.mubr.msk.bf16.vlgmr.msra.gmra.mrb[20].mxu1 %vm741_vm4, %v979_v13  ;;  %v2537_v13 = vld [vmem:[%s3342_s8 + $0x8c] ss:$16 sps:$4 sm:$0xff]  }
 0x54f   : > { %2397 = vmatpush3.bf16.msra.mxu1 %v1098_v15  ;;  %2398 = vmatprep.mubr.msk.bf16.mxu1 %vm2688_vm0, %v2687_v4  ;;  %v2535_v15 = vld [vmem:[%s3342_s8 + $0x88] ss:$16 sps:$4 sm:$0xff]  }
 0x556   : > { %2399 = vmatmul.mubr.msk.bf16.vlgmr.msra.gmra.mrb[24].mxu1 %vm741_vm4, %v1091_v17  ;;  %v2543_v17 = vld [vmem:[%s3342_s8 + $0xac] ss:$16 sps:$4 sm:$0xff]  }
 0x557   : > { %1545 = vmatprep.mubr.bf16.mxu1 %v2686_v2 }
 0x619   : > { %v910_v27 = vpop.f32.mrb[16].mxu1 }
 0x61a   : > { %1141 = vrot.lane.b32.xlu0 %v910_v27, %s2691_s15  ;;  %v2376_v28 = vpop.f32.mrb[17].mxu1  ;;  %v2555_v27 = vld [vmem:[%s3342_s8 + $0xec] ss:$16 sps:$4 sm:$0xff]  }
 0x61b   : > { %v913_v31 = vpop.f32.mrb[18].mxu1  ;;  %v2550_v28 = vld [vmem:[%s3342_s8 + $0xe0] ss:$16 sps:$4 sm:$0xff]  }
 0x61c   : > { %v2377_v33 = vpop.f32.mrb[19].mxu1  ;;  %v2553_v31 = vld [vmem:[%s3342_s8 + $0xe8] ss:$16 sps:$4 sm:$0xff]  }
 0x621   : > { %v1022_v35 = vpop.f32.mrb[20].mxu1 }
 0x622   : > { %1145 = vrot.lane.b32.xlu1 %v1022_v35, %s2690_s29  ;;  %v2388_v36 = vpop.f32.mrb[21].mxu1 }
 0x623   : > { %v1025_v37 = vpop.f32.mrb[22].mxu1 }
 0x624   : > { %v2389_v38 = vpop.f32.mrb[23].mxu1  ;;  %v2185_v37 = vld [vmem:[%s3340_s6] ss:$0 sm:$0xff] }
 0x629   : > { %v1134_v39 = vpop.f32.mrb[24].mxu1 }
 0x62a   : > { %1149 = vrot.lane.b32.xlu0 %v1134_v39, %s2689_s28  ;;  %v2400_v40 = vpop.f32.mrb[25].mxu1  ;;  %v2186_v39 = vld [vmem:[%s3341_s7] ss:$0 sm:$0xff]  ;;  %s3292_s28 = scalar_lea.hbm %s3346_s12, %s2253_s17 }
 0x62b   : > { %v1137_v41 = vpop.f32.mrb[26].mxu1 }
 0x62c   : > { %v2401_v42 = vpop.f32.mrb[27].mxu1 }
 0x68c   : > { %v1142_v43 = vpop.permute.xlu0 %1141 }
 0x68d   : > { %v1152_v45 = vsel %vm692_vm1, %v2970_v21, %v1142_v43  ;;  %v2508_v21 = vld [vmem:[%s3342_s8] ss:$16 sps:$4 sm:$0xff]  }
 0x68e   : > { %v2556_v43 = vld [vmem:[%s3344_s10 + $0x40] sm:$0xff]  }
 0x694   : > { %v1146_v4 = vpop.permute.xlu1 %1145 }
 0x695   : > { %v1154_v46 = vsel %vm1153_vm5, %v1152_v45, %v1146_v4  ;;  %v2557_v4 = vld [vmem:[%s3344_s10 + $0xc0] sm:$0xff]  }
 0x696   : > { %v2558_v45 = vld [vmem:[%s3344_s10] sm:$0xff]  }
 0x69c   : > { %v1150_v47 = vpop.permute.xlu0 %1149 }
 0x69d   : > { %v1156_v48 = vsel %vm1155_vm6, %v1154_v46, %v1150_v47  ;;  %v2559_v46 = vld [vmem:[%s3344_s10 + $0x80] sm:$0xff]   ;;  %v2560_v47 = vld [vmem:[%s3344_s10 + $0x48] sm:$0xff]  }
 0x69e   : > { %v1157_v49 = vpack.c.bf16 %v1156_v48, %v1156_v48  ;;  %v2561_v48 = vld [vmem:[%s3344_s10 + $0xc8] sm:$0xff]  }
 0x6a0   : > { %2419 = vmatmul.mubr.bf16.vlgmr.msra.gmra.mrb[12].mxu0 %v1157_v49  ;;  %v2562_v49 = vld [vmem:[%s3344_s10 + $0x8] sm:$0xff]  }
 0x6a1   : > { %1586 = vmatprep.mubr.bf16.mxu0 %v2686_v2  ;;  %v2510_v2 = vld [vmem:[%s3342_s8 + $0x4] ss:$16 sps:$4 sm:$0xff]   ;;  %1555 = vmatpush1.bf16.msra.mxu0 %v2511_v59 }
 0x6a2   : > { %1513 = vmatprep.subr.bf16.mxu1 %v2510_v2  ;;  %1556 = vmatprep.subr.bf16.mxu0 %v2519_v60  ;;  %v2571_v2 = vld [vmem:[%s3344_s10 + $0x98] sm:$0xff]   ;;  %v2572_v59 = vld [vmem:[%s3344_s10 + $0x60] sm:$0xff]  }
 0x6a3   : > { %1514 = vmatpush1.bf16.msra.mxu1 %v2508_v21  ;;  %v2570_v21 = vld [vmem:[%s3344_s10 + $0x18] sm:$0xff]   ;;  %v2575_v60 = vld [vmem:[%s3344_s10 + $0xa0] sm:$0xff]  }
 0x6a5   : > { %1557 = vmatpush1.bf16.msra.mxu0 %v2517_v62  ;;  %v2577_v62 = vld [vmem:[%s3344_s10 + $0xe8] sm:$0xff]  }
 0x6a6   : > { %1558 = vmatprep.subr.bf16.mxu0 %v2525_v0  ;;  %v2579_v0 = vld [vmem:[%s3344_s10 + $0xa8] sm:$0xff]  }
 0x6a9   : > { %1559 = vmatpush1.bf16.msra.mxu0 %v2523_v3  ;;  %v2581_v3 = vld [vmem:[%s3344_s10 + $0xf0] sm:$0xff]  }
 0x6aa   : > { %1560 = vmatprep.subr.bf16.mxu0 %v2531_v10  ;;  %v2587_v10 = vld [vmem:[%s3344_s10 + $0xb8] sm:$0xff]  }
 0x6ad   : > { %1561 = vmatpush1.bf16.msra.mxu0 %v2529_v50  ;;  %v1347_v50 = vsub.s32 3, %v2910_v29 }
 0x6ae   : > { %1562 = vmatprep.subr.bf16.mxu0 %v2537_v13 }
 0x6b1   : > { %1563 = vmatpush1.bf16.msra.mxu0 %v2535_v15 }
 0x6b2   : > { %1564 = vmatprep.subr.bf16.mxu0 %v2543_v17 }
 0x6b5   : > { %1565 = vmatpush1.bf16.msra.mxu0 %v2541_v19 }
 0x6b6   : > { %1566 = vmatprep.subr.bf16.mxu0 %v2549_v22 }
 0x6b9   : > { %1567 = vmatpush1.bf16.msra.mxu0 %v2547_v25 }
 0x6ba   : > { %1568 = vmatprep.subr.bf16.mxu0 %v2555_v27 }
 0x6bd   : > { %1569 = vmatpush1.bf16.msra.mxu0 %v2553_v31 }
 0x6be   : > { %2312 = vmatprep.subr.bf16.mxu0 %v2557_v4 }
 0x773   : > { %v1263_v52 = vpop.f32.mrb[12].mxu0 }
 0x774   : > { %v1264_v54 = vadd.f32 %v2176_v51, %v1263_v52  ;;  %v2420_v55 = vpop.f32.mrb[13].mxu0  ;;  %v2563_v51 = vld [vmem:[%s3344_s10 + $0x88] sm:$0xff]   ;;  %v2564_v52 = vld [vmem:[%s3344_s10 + $0x50] sm:$0xff]  }
 0x775   : > { %v1266_v56 = vpop.f32.mrb[14].mxu0  ;;  %v2566_v55 = vld [vmem:[%s3344_s10 + $0x10] sm:$0xff]  }
 0x776   : > { %v2421_v57 = vpop.f32.mrb[15].mxu0  ;;  %v1269_v58 = vadd.f32 %v1264_v54, %v2885_v23  ;;  %v2516_v23 = vld [vmem:[%s3342_s8 + $0x24] ss:$16 sps:$4 sm:$0xff]  }
 0x777   : > { %1515 = vmatprep.subr.bf16.mxu1 %v2516_v23  ;;  %v2565_v54 = vld [vmem:[%s3344_s10 + $0xd0] sm:$0xff]   ;;  %v2568_v57 = vld [vmem:[%s3344_s10 + $0x58] sm:$0xff]   ;;  %v2574_v23 = vld [vmem:[%s3344_s10 + $0x20] sm:$0xff]  }
 0x778   : > { %1270 = vadd.xlane.f32.xlu1 %v1269_v58  ;;  %1516 = vmatpush1.bf16.msra.mxu1 %v2514_v61  ;;  %v2567_v56 = vld [vmem:[%s3344_s10 + $0x90] sm:$0xff]   ;;  %v2576_v61 = vld [vmem:[%s3344_s10 + $0x68] sm:$0xff]  }
 0x779   : > { %1517 = vmatprep.subr.bf16.mxu1 %v2522_v63  ;;  %v2578_v63 = vld [vmem:[%s3344_s10 + $0x28] sm:$0xff]  }
 0x77c   : > { %1518 = vmatpush1.bf16.msra.mxu1 %v2520_v1  ;;  %v2580_v1 = vld [vmem:[%s3344_s10 + $0x70] sm:$0xff]  }
 0x77d   : > { %1519 = vmatprep.subr.bf16.mxu1 %v2528_v9  ;;  %v2586_v9 = vld [vmem:[%s3344_s10 + $0x38] sm:$0xff]  }
 0x780   : > { %1520 = vmatpush1.bf16.msra.mxu1 %v2526_v11  ;;  %v1331_v11 = vld [vmem:[%s3343_s9] sm:$0xf] }
 0x781   : > { %1521 = vmatprep.subr.bf16.mxu1 %v2534_v12  ;;  %v1336_v12 = vrot.slane %v1331_v11, %v465_v32  ;;  %v1344_v13 = vrot.slane %v1331_v11, %v473_v44  ;;  %v1348_v15 = vrot.slane %v1331_v11, %v1347_v50 }
 0x784   : > { %1522 = vmatpush1.bf16.msra.mxu1 %v2532_v14  ;;  %v1340_v14 = vrot.slane %v1331_v11, %v469_v30 }
 0x785   : > { %1523 = vmatprep.subr.bf16.mxu1 %v2540_v16 }
 0x788   : > { %1524 = vmatpush1.bf16.msra.mxu1 %v2538_v18 }
 0x789   : > { %1525 = vmatprep.subr.bf16.mxu1 %v2546_v20 }
 0x78c   : > { %1526 = vmatpush1.bf16.msra.mxu1 %v2544_v24 }
 0x78d   : > { %1527 = vmatprep.subr.bf16.mxu1 %v2552_v26 }
 0x790   : > { %1528 = vmatpush1.bf16.msra.mxu1 %v2550_v28 }
 0x791   : > { %2290 = vmatprep.subr.bf16.mxu1 %v2556_v43 }
 0x805   : > { %v1271_v5 = vpop.xlane.xlu1 %1270 }
 0x806   : > { %v1273_v6 = vmul.f32 0.0078125, %v1271_v5  ;;  %v2582_v5 = vld [vmem:[%s3344_s10 + $0x30] sm:$0xff]  }
 0x808   : > { %v1274_v7 = vsub.f32 %v1269_v58, %v1273_v6  ;;  %v2569_v58 = vld [vmem:[%s3344_s10 + $0xd8] sm:$0xff]   ;;  %v2583_v6 = vld [vmem:[%s3344_s10 + $0xb0] sm:$0xff]  }
 0x80a   : > { %v1275_v8 = vmul.f32 %v1274_v7, %v1274_v7 }
 0x80c   : > { %1276 = vadd.xlane.f32.xlu0 %v1275_v8  ;;  %v2585_v8 = vld [vmem:[%s3344_s10 + $0xf8] sm:$0xff]  }
 0x899   : > { %v1277_v33 = vpop.xlane.xlu0 %1276 }
 0x89a   : > { %v1278_v34 = vmul.f32 0.0078125, %v1277_v33 }
 0x89c   : > { %v1279_v35 = vadd.f32 1e-05, %v1278_v34 }
 0x89e   : > { %2604 = vrsqrt.f32 %v1279_v35 }
 0x8a8   : > { %v2605_v36 = vpop.eup %2604 }
 0x8a9   : > { %v1281_v38 = vmul.f32 %v2605_v36, %v1274_v7  ;;  %v2584_v7 = vld [vmem:[%s3344_s10 + $0x78] sm:$0xff]  }
 0x8ab   : > { %v1289_v40 = vmul.f32 %v2185_v37, %v1281_v38 }
 0x8ad   : > { %v1297_v41 = vadd.f32 %v2186_v39, %v1289_v40 }
 0x8af   : > { %v1298_v42 = vpack.c.bf16 %v1297_v41, %v1297_v41 }
 0x8b1   : > { %1546 = vmatmul.mubr.bf16.vlgmr.msra.gmra.mrb[28].mxu1 %v1298_v42  ;;  %1587 = vmatmul.mubr.bf16.vlgmr.msra.gmra.mrb[16].mxu0 %v1298_v42 }
 0x8b2   : > { %2291 = vmatpush3.bf16.msra.mxu1 %v2558_v45  ;;  %2313 = vmatpush3.bf16.msra.mxu0 %v2559_v46 }
 0x8b3   : > { %2292 = vmatprep.subr.bf16.mxu1 %v2560_v47  ;;  %2314 = vmatprep.subr.bf16.mxu0 %v2561_v48 }
 0x8b6   : > { %2293 = vmatpush3.bf16.msra.mxu1 %v2562_v49  ;;  %2315 = vmatpush3.bf16.msra.mxu0 %v2563_v51 }
 0x8b7   : > { %2294 = vmatprep.subr.bf16.mxu1 %v2564_v52  ;;  %2316 = vmatprep.subr.bf16.mxu0 %v2565_v54 }
 0x8ba   : > { %2295 = vmatpush3.bf16.msra.mxu1 %v2566_v55  ;;  %2317 = vmatpush3.bf16.msra.mxu0 %v2567_v56 }
 0x8bb   : > { %2296 = vmatprep.subr.bf16.mxu1 %v2568_v57  ;;  %2318 = vmatprep.subr.bf16.mxu0 %v2569_v58 }
 0x8be   : > { %2297 = vmatpush3.bf16.msra.mxu1 %v2570_v21  ;;  %2319 = vmatpush3.bf16.msra.mxu0 %v2571_v2 }
 0x8bf   : > { %2298 = vmatprep.subr.bf16.mxu1 %v2572_v59  ;;  %2320 = vmatprep.subr.bf16.mxu0 %v2573_v53 }
 0x8c2   : > { %2299 = vmatpush3.bf16.msra.mxu1 %v2574_v23  ;;  %2321 = vmatpush3.bf16.msra.mxu0 %v2575_v60 }
 0x8c3   : > { %2300 = vmatprep.subr.bf16.mxu1 %v2576_v61  ;;  %2322 = vmatprep.subr.bf16.mxu0 %v2577_v62 }
 0x8c6   : > { %2301 = vmatpush3.bf16.msra.mxu1 %v2578_v63  ;;  %2323 = vmatpush3.bf16.msra.mxu0 %v2579_v0 }
 0x8c7   : > { %2302 = vmatprep.subr.bf16.mxu1 %v2580_v1  ;;  %2324 = vmatprep.subr.bf16.mxu0 %v2581_v3 }
 0x8ca   : > { %2303 = vmatpush3.bf16.msra.mxu1 %v2582_v5  ;;  %2325 = vmatpush3.bf16.msra.mxu0 %v2583_v6 }
 0x8cb   : > { %2304 = vmatprep.subr.bf16.mxu1 %v2584_v7  ;;  %2326 = vmatprep.subr.bf16.mxu0 %v2585_v8 }
 0x8ce   : > { %2305 = vmatpush3.bf16.msra.mxu1 %v2586_v9  ;;  %2327 = vmatpush3.bf16.msra.mxu0 %v2587_v10 }
 0x984   : > { %v1547_v16 = vpop.f32.mrb[28].mxu1  ;;  %v1588_v17 = vpop.f32.mrb[16].mxu0 }
 0x985   : > { %v3252_v18 = vadd.f32 %v1547_v16, %v1336_v12  ;;  %v3254_v19 = vadd.f32 %v1588_v17, %v1344_v13  ;;  %v1549_v20 = vpop.f32.mrb[29].mxu1  ;;  %v1590_v22 = vpop.f32.mrb[17].mxu0 }
 0x986   : > { %v3256_v24 = vadd.f32 %v1549_v20, %v1340_v14  ;;  %v3258_v25 = vadd.f32 %v1590_v22, %v1348_v15  ;;  %v1551_v32 = vpop.f32.mrb[30].mxu1  ;;  %v1592_v26 = vpop.f32.mrb[18].mxu0 }
 0x987   : > { %v3261_v44 = vmul.f32 0.70710677, %v3252_v18  ;;  %v3264_v29 = vmul.f32 0.70710677, %v3254_v19  ;;  %v1552_v34 = vpop.f32.mrb[31].mxu1  ;;  %v1593_v38 = vpop.f32.mrb[19].mxu0 }
 0x988   : > { %v3267_v30 = vmul.f32 0.70710677, %v3256_v24  ;;  %v3273_v33 = vmul.f32 0.70710677, %v3258_v25 }
 0x989   : > { %v1612_v27 = vand.u32 2147483647, %v3261_v44  ;;  %v1614_v28 = vand.u32 2147483647, %v3264_v29  ;;  %vm1604_vm7 = vcmp.ge.f32.partialorder %v3261_v44, 0.0  ;;  %vm1606_vm8 = vcmp.ge.f32.partialorder %v3264_v29, 0.0 }
 0x98a   : > { %v1613_v31 = vand.u32 2147483647, %v3267_v30  ;;  %v1615_v41 = vand.u32 2147483647, %v3273_v33  ;;  %vm1605_vm9 = vcmp.ge.f32.partialorder %v3267_v30, 0.0  ;;  %vm1607_vm10 = vcmp.ge.f32.partialorder %v3273_v33, 0.0 }
 0x98b   : > { %v1616_v35 = vmul.f32 0.3275911, %v1612_v27  ;;  %v1618_v36 = vmul.f32 0.3275911, %v1614_v28  ;;  %v1668_v45 = vsub.f32 0.0, %v1612_v27  ;;  %v1670_v46 = vsub.f32 0.0, %v1614_v28 }
 0x98c   : > { %v1617_v37 = vmul.f32 0.3275911, %v1613_v31  ;;  %v1619_v43 = vmul.f32 0.3275911, %v1615_v41  ;;  %v1669_v49 = vsub.f32 0.0, %v1613_v31  ;;  %v1671_v56 = vsub.f32 0.0, %v1615_v41 }
 0x98d   : > { %v1620_v39 = vadd.f32 1.0, %v1616_v35  ;;  %v1622_v40 = vadd.f32 1.0, %v1618_v36  ;;  %v1672_v48 = vmul.f32 %v1668_v45, %v1612_v27  ;;  %v1674_v54 = vmul.f32 %v1670_v46, %v1614_v28 }
 0x98e   : > { %v1621_v42 = vadd.f32 1.0, %v1617_v37  ;;  %v1623_v4 = vadd.f32 1.0, %v1619_v43  ;;  %v1673_v59 = vmul.f32 %v1669_v49, %v1613_v31  ;;  %v1675_v63 = vmul.f32 %v1671_v56, %v1615_v41 }
 0x98f   : > { %2606 = vrcp.f32 %v1620_v39  ;;  %v1676_v21 = vmul.f32 1.442695, %v1672_v48  ;;  %v1680_v23 = vmul.f32 1.442695, %v1674_v54  ;;  %v2692_v46 = vmov -1.0  }
 0x990   : > { %2608 = vrcp.f32 %v1622_v40  ;;  %v1678_v6 = vmul.f32 1.442695, %v1673_v59  ;;  %v1682_v11 = vmul.f32 1.442695, %v1675_v63  ;;  %v1608_v48 = vsel %vm1604_vm7, 1.0, %v2692_v46 }
 0x991   : > { %2610 = vrcp.f32 %v1621_v42  ;;  %v1595_v59 = vmul.f32 0.5, %v3252_v18  ;;  %v1597_v63 = vmul.f32 0.5, %v3254_v19  ;;  %v2219_v19 = vld [vmem:[%s3345_s11] ss:$0 sm:$0xff] }
 0x992   : > { %2612 = vrcp.f32 %v1623_v4 }
 0x993   : > { %2614 = vpow2.f32 %v1676_v21  ;;  %v1609_v21 = vsel %vm1605_vm9, 1.0, %v2692_v46 }
 0x994   : > { %2616 = vpow2.f32 %v1680_v23  ;;  %v1611_v23 = vsel %vm1607_vm10, 1.0, %v2692_v46 }
 0x995   : > { %2618 = vpow2.f32 %v1678_v6 }
 0x996   : > { %2620 = vpow2.f32 %v1682_v11 }
 0x999   : > { %v2607_v47 = vpop.eup %2606 }
 0x99a   : > { %v2609_v51 = vpop.eup %2608  ;;  %v1632_v52 = vmul.f32 1.0614054, %v2607_v47 }
 0x99b   : > { %v1634_v55 = vmul.f32 1.0614054, %v2609_v51  ;;  %v2611_v58 = vpop.eup %2610 }
 0x99c   : > { %v1636_v57 = vadd.f32 -1.4531521, %v1632_v52  ;;  %v1633_v60 = vmul.f32 1.0614054, %v2611_v58  ;;  %v2613_v61 = vpop.eup %2612 }
 0x99d   : > { %v1638_v2 = vadd.f32 -1.4531521, %v1634_v55  ;;  %v1635_v3 = vmul.f32 1.0614054, %v2613_v61  ;;  %v2615_v35 = vpop.eup %2614 }
 0x99e   : > { %v1640_v53 = vmul.f32 %v2607_v47, %v1636_v57  ;;  %v1637_v1 = vadd.f32 -1.4531521, %v1633_v60  ;;  %v2617_v37 = vpop.eup %2616  ;;  %v1596_v60 = vmul.f32 0.5, %v3256_v24 }
 0x99f   : > { %v1642_v62 = vmul.f32 %v2609_v51, %v1638_v2  ;;  %v1639_v9 = vadd.f32 -1.4531521, %v1635_v3  ;;  %v2619_v45 = vpop.eup %2618 }
 0x9a0   : > { %v1644_v0 = vadd.f32 1.4214138, %v1640_v53  ;;  %v1641_v8 = vmul.f32 %v2611_v58, %v1637_v1  ;;  %v2621_v54 = vpop.eup %2620 }
 0x9a1   : > { %v1646_v5 = vadd.f32 1.4214138, %v1642_v62  ;;  %v1643_v13 = vmul.f32 %v2613_v61, %v1639_v9 }
 0x9a2   : > { %v1648_v7 = vmul.f32 %v2607_v47, %v1644_v0  ;;  %v1645_v12 = vadd.f32 1.4214138, %v1641_v8  ;;  %v1598_v0 = vmul.f32 0.5, %v3258_v25 }
 0x9a3   : > { %v1650_v10 = vmul.f32 %v2609_v51, %v1646_v5  ;;  %v1647_v17 = vadd.f32 1.4214138, %v1643_v13 }
 0x9a4   : > { %v1652_v50 = vadd.f32 -0.28449672, %v1648_v7  ;;  %v1649_v16 = vmul.f32 %v2611_v58, %v1645_v12 }
 0x9a5   : > { %v1654_v14 = vadd.f32 -0.28449672, %v1650_v10  ;;  %v1651_v26 = vmul.f32 %v2613_v61, %v1647_v17 }
 0x9a6   : > { %v1656_v15 = vmul.f32 %v2607_v47, %v1652_v50  ;;  %v1653_v32 = vadd.f32 -0.28449672, %v1649_v16 }
 0x9a7   : > { %v1658_v20 = vmul.f32 %v2609_v51, %v1654_v14  ;;  %v1655_v34 = vadd.f32 -0.28449672, %v1651_v26 }
 0x9a8   : > { %v1660_v22 = vadd.f32 0.2548296, %v1656_v15  ;;  %v1657_v31 = vmul.f32 %v2611_v58, %v1653_v32 }
 0x9a9   : > { %v1662_v27 = vadd.f32 0.2548296, %v1658_v20  ;;  %v1659_v40 = vmul.f32 %v2613_v61, %v1655_v34 }
 0x9aa   : > { %v1664_v28 = vmul.f32 %v2607_v47, %v1660_v22  ;;  %v1661_v39 = vadd.f32 0.2548296, %v1657_v31  ;;  %v1610_v47 = vsel %vm1606_vm8, 1.0, %v2692_v46 }
 0x9ab   : > { %v1666_v36 = vmul.f32 %v2609_v51, %v1662_v27  ;;  %v1663_v4 = vadd.f32 0.2548296, %v1659_v40 }
 0x9ac   : > { %v1684_v38 = vmul.f32 %v2615_v35, %v1664_v28  ;;  %v1665_v43 = vmul.f32 %v2611_v58, %v1661_v39 }
 0x9ad   : > { %v1686_v41 = vmul.f32 %v2617_v37, %v1666_v36  ;;  %v1667_v51 = vmul.f32 %v2613_v61, %v1663_v4 }
 0x9ae   : > { %v1688_v42 = vsub.f32 1.0, %v1684_v38  ;;  %v1685_v44 = vmul.f32 %v2619_v45, %v1665_v43 }
 0x9af   : > { %v1690_v49 = vsub.f32 1.0, %v1686_v41  ;;  %v1687_v29 = vmul.f32 %v2621_v54, %v1667_v51 }
 0x9b0   : > { %v1692_v52 = vmul.f32 %v1688_v42, %v1608_v48  ;;  %v1689_v56 = vsub.f32 1.0, %v1685_v44 }
 0x9b1   : > { %v1694_v55 = vmul.f32 %v1690_v49, %v1610_v47  ;;  %v1691_v2 = vsub.f32 1.0, %v1687_v29 }
 0x9b2   : > { %v1696_v57 = vadd.f32 1.0, %v1692_v52  ;;  %v1693_v58 = vmul.f32 %v1689_v56, %v1609_v21 }
 0x9b3   : > { %v1698_v53 = vadd.f32 1.0, %v1694_v55  ;;  %v1695_v62 = vmul.f32 %v1691_v2, %v1611_v23 }
 0x9b4   : > { %v1697_v30 = vadd.f32 1.0, %v1693_v58  ;;  %v1700_v61 = vmul.f32 %v1696_v57, %v1595_v59 }
 0x9b5   : > { %v1699_v1 = vadd.f32 1.0, %v1695_v62  ;;  %v1702_v3 = vmul.f32 %v1698_v53, %v1597_v63 }
 0x9b6   : > { %v1701_v33 = vmul.f32 %v1697_v30, %v1596_v60  ;;  %v1704_v7 = vpack.c.bf16 %v1700_v61, %v1700_v61 }
 0x9b7   : > { %v1703_v6 = vmul.f32 %v1699_v1, %v1598_v0  ;;  %v1706_v8 = vpack.c.bf16 %v1702_v3, %v1702_v3 }
 0x9b8   : > { %v1705_v5 = vpack.c.bf16 %v1701_v33, %v1701_v33 }
 0x9b9   : > { %v1707_v18 = vpack.c.bf16 %v1703_v6, %v1703_v6 }
 0x9ba   : > { %2003 = vmatprep.mubr.bf16.mxu1 %v1705_v5 }
 0x9bb   : > { %2004 = vmatmul.mubr.bf16.vlgmr.msra.gmra.mrb[32].mxu1 %v1704_v7  ;;  %2043 = vmatprep.mubr.bf16.mxu0 %v1707_v18 }
 0x9bc   : > { %2044 = vmatmul.mubr.bf16.vlgmr.msra.gmra.mrb[20].mxu0 %v1706_v8 }
 0xa8e   : > { %v2306_v24 = vpop.f32.mrb[32].mxu1 }
 0xa8f   : > { %v2307_v25 = vpop.f32.mrb[33].mxu1  ;;  %v2328_v9 = vpop.f32.mrb[20].mxu0 }
 0xa90   : > { %v2308_v10 = vadd.f32 %v2307_v25, %v2306_v24  ;;  %v2309_v11 = vpop.f32.mrb[34].mxu1  ;;  %v2329_v50 = vpop.f32.mrb[21].mxu0 }
 0xa91   : > { %v2310_v12 = vpop.f32.mrb[35].mxu1  ;;  %v2330_v14 = vadd.f32 %v2329_v50, %v2328_v9  ;;  %v2331_v15 = vpop.f32.mrb[22].mxu0 }
 0xa92   : > { %v2006_v13 = vadd.f32 %v2308_v10, %v2219_v19  ;;  %v2332_v16 = vpop.f32.mrb[23].mxu0 }
 0xa94   : > { %v2046_v17 = vadd.f32 %v2330_v14, %v2006_v13 }
 0xa96   : > { %2051 = vst [vmem:[%s417_s23] sm:$0xff] %v2046_v17 }
 0xa97   : > { %2635 = shalt.err (!%p2632_p3)
}
 0xa98   : > { %s2636_s18 = scalar_lea.hbm %s3292_s28, 128  ;;  %s2640_s29 = scalar_lea.hbm %s3346_s12, 256 }
 0xa99   : > { %p2637_p4 = scmp.ne.s32.totalorder %s3292_s28, %s2636_s18  ;;  %p2641_p9 = scmp.lt.u32.totalorder %s3292_s28, %s3346_s12 }
 0xa9a   : > { %p2642_p10 = scmp.lt.u32.totalorder %s2640_s29, %s2636_s18  ;;  %p2644_p12 = scmp.lt.u32.totalorder %s2636_s18, %s3292_s28 }
 0xa9b   : > { %p2638_p7 = pnand %p2637_p4, %p2797_p5 }
 0xa9c   : > { %p2643_p11 = por %p2642_p10, %p2641_p9 }
 0xa9d   : > { %p2639_p8 = pneg %p2638_p7 }
 0xa9e   : > { %p2645_p13 = por %p2644_p12, %p2643_p11 }
 0xaa0   : > { %p2646_p0 = pnand %p2645_p13, %p2639_p8 }
 0xaa2   : > { %2649 = shalt.err (!%p2646_p0)
}
 0xaa3   : > { %2422 = dma.vmem_to_hbm [thread:$0]  (%p2797_p5), %s3294_s30, 128, %s3292_s28, %s2053_s26  }
 0xaa4 PF: > { %p2428_p1 = scmp.ge.s32.totalorder %s2684_s24, 2  ;;  %s2078_s25 = sand.u32 1, %s2672_s21  }
 0xaa5   : > { %s2079_s20 = scalar_lea.sflag [#allocation3], %s2078_s25 }
 0xaa6   : > { %p2425_p2 = pnand %p2428_p1, %p2801_p6 }
 0xaa8   : > { %2667 = dma.done.wait (!%p2425_p2), %s2079_s20, 128  }
 0xaa9   : > { %2669 = vsyncadd (!%p2425_p2), %s2079_s20, 4294967168  ;;  %s3354_s16 = sld [smem:[#allocation5_spill]]  ;;  %s3355_s23 = sld [smem:[#allocation6_spill]] }
 0xaaa   : > { %p22_p3 = scmp.ge.s32.totalorder %s2784_s27, 4   ;;  %s3356_s21 = smov %s2676_s22 }
 0xaab   : > { %s3358_s24 = smov %s2784_s27 }
 0xaac   :  { %24 = sbr.rel (!%p22_p3) target bundleno = 3 (0x3), region = 106 }
 0xaaf   : > { %s3357_s22 = smov %s3354_s16 }
 0xab3   :  { %2084 = vsyncpa [#allocation3], 1 }
 0xab4   :  { %2086 = vsyncpa [#allocation3 + $0x1], 1 }

</bundles_post_ra>
